<compile_context>
chip_gen: v5e
topology: v5e:2x2
jax: 0.10.0
libtpu: 0.0.40
codegen_flags: <defaults>
</compile_context>

<pallas_src>
import jax
import jax.numpy as jnp
from jax.experimental import pallas as pl
from jax.experimental.pallas import tpu as pltpu

# ----------------------------- hyper-parameters ------------------------------
EMBED_DIM = 16          # embed_dim
KERNEL_NUM = 8          # kernel_num
MOVIE_COMMENTS_DIM = 8  # movie_comments_dim (TextCnn output_dim)
WINDOW_SIZES = (2, 3, 4)

SOCIALTYPE_MAX = 5
UID_MAX = 50
MOVIE_TYPES_MAX = 10
MOVIE_ID_MAX = 60
MOVIE_CTOKENS_MAX = 100

BATCH = 2
N_MOVIE_TYPES = 4       # movie_types sequence length
COMMENT_LEN = 12        # movie_comments sequence length

LANES = 128             # slab lane width (f32)

# ----------------------- packed parameter slab layout -------------------------
_SLAB_SPEC = (
    ("conv_w",     (EMBED_DIM, sum(WINDOW_SIZES) * KERNEL_NUM)),   # (16, 72)
    ("conv_b",     (1, len(WINDOW_SIZES) * KERNEL_NUM)),           # (1, 24)
    ("tfc_w",      (len(WINDOW_SIZES) * KERNEL_NUM, MOVIE_COMMENTS_DIM)),
    ("tfc_b",      (1, MOVIE_COMMENTS_DIM)),
    ("ufc1_w",     (2 * EMBED_DIM, 32)),
    ("ufc1_b",     (1, 32)),
    ("ufc2_w",     (32, 16)),
    ("ufc2_b",     (1, 16)),
    ("mfc1_w",     (2 * EMBED_DIM, 32)),
    ("mfc1_b",     (1, 32)),
    ("mfc2_w",     (32 + MOVIE_COMMENTS_DIM, 32)),
    ("mfc2_b",     (1, 32)),
    ("mfc3_w",     (32, 16)),
    ("mfc3_b",     (1, 16)),
    ("soc_table",  (SOCIALTYPE_MAX + 1, EMBED_DIM)),
    ("uid_table",  (UID_MAX + 1, EMBED_DIM)),
    ("mtyp_table", (MOVIE_TYPES_MAX + 2, EMBED_DIM)),
    ("mid_table",  (MOVIE_ID_MAX + 1, EMBED_DIM)),
    ("ctok_table", (MOVIE_CTOKENS_MAX + 2, EMBED_DIM)),
)


def _build_layout():
    offs, row = {}, 0
    for name, (r, _c) in _SLAB_SPEC:
        offs[name] = row
        row += r
        row += (-row) % 8          # keep every entry 8-sublane aligned
    return offs, row


SLAB_OFFS, SLAB_ROWS = _build_layout()


# --------------------------------- kernel ------------------------------------
def model_kernel(uid_ref, soc_ref, mid_ref, mtyp_ref, com_ref,   # SMEM int32 indices
                 slab_ref,                                       # VMEM packed params
                 out_ref,                                        # VMEM (B, 1) output
                 com_scr):                                       # VMEM scratch (B*L, E)
    f32 = jnp.float32
    E, K, C = EMBED_DIM, KERNEL_NUM, MOVIE_COMMENTS_DIM
    B, L = com_ref.shape
    _, T = mtyp_ref.shape

    def wmat(name, rows, cols):                  # static slab slice (weights/biases)
        r0 = SLAB_OFFS[name]
        return slab_ref[r0:r0 + rows, 0:cols]

    def table_row(name, idx):                    # dynamic embedding-row gather
        return slab_ref[pl.ds(SLAB_OFFS[name] + idx, 1), 0:E]    # (1, E)

    # ---- in-kernel embedding gathers (SMEM indices + dynamic row reads) ------
    for b in range(B):
        for l in range(L):
            com_scr[b * L + l:b * L + l + 1, :] = table_row("ctok_table",
                                                            com_ref[b, l])

    uid_e = jnp.concatenate([table_row("uid_table", uid_ref[b, 0])
                             for b in range(B)], axis=0)         # (B, E)
    soc_e = jnp.concatenate([table_row("soc_table", soc_ref[b, 0])
                             for b in range(B)], axis=0)         # (B, E)
    mid_e = jnp.concatenate([table_row("mid_table", mid_ref[b, 0])
                             for b in range(B)], axis=0)         # (B, E)

    mtyp_rows = []
    for b in range(B):
        acc = table_row("mtyp_table", mtyp_ref[b, 0])
        for t in range(1, T):
            acc = acc + table_row("mtyp_table", mtyp_ref[b, t])
        mtyp_rows.append(acc)
    mtyp_e = jnp.concatenate(mtyp_rows, axis=0)                  # (B, E)

    # ---- TextCnn: ONE matmul for all conv windows, shifted adds, max-pool ----
    n_off = sum(WINDOW_SIZES)                                    # 9 offset matrices
    w_conv = wmat("conv_w", E, n_off * K)                        # (E, 72)
    conv_b = wmat("conv_b", 1, len(WINDOW_SIZES) * K)            # (1, 24)
    com = com_scr[...]                                           # (B*L, E)
    m = jnp.dot(com, w_conv, preferred_element_type=f32)         # (B*L, 72)

    pooled_rows = []
    for b in range(B):
        base = b * L
        win_outs = []
        col = 0
        for w_idx, ws in enumerate(WINDOW_SIZES):
            t_out = L - ws + 1
            s = m[base:base + t_out, col:col + K]
            col += K
            for i in range(1, ws):
                s = s + m[base + i:base + i + t_out, col:col + K]
                col += K
            s = jnp.maximum(s + conv_b[:, w_idx * K:(w_idx + 1) * K], 0.0)
            win_outs.append(jnp.max(s, axis=0, keepdims=True))   # (1, K)
        pooled_rows.append(jnp.concatenate(win_outs, axis=1))    # (1, 3K)
    pooled = jnp.concatenate(pooled_rows, axis=0)                # (B, 3K)

    # TODO(synk): nn.Dropout(0.5) is treated as identity (inference mode).
    comments = (jnp.dot(pooled, wmat("tfc_w", len(WINDOW_SIZES) * K, C),
                        preferred_element_type=f32)
                + wmat("tfc_b", 1, C))                           # (B, C)

    # ---- user tower: cat([uid, socialtype]) -> fc1 -> fc2 (fused weights) ----
    user = (jnp.dot(jnp.concatenate([uid_e, soc_e], axis=1),
                    wmat("ufc1_w", 2 * E, 32), preferred_element_type=f32)
            + wmat("ufc1_b", 1, 32))
    user = (jnp.dot(user, wmat("ufc2_w", 32, 16), preferred_element_type=f32)
            + wmat("ufc2_b", 1, 16))

    # ---- movie tower ---------------------------------------------------------
    movie = (jnp.dot(jnp.concatenate([mtyp_e, mid_e], axis=1),
                     wmat("mfc1_w", 2 * E, 32), preferred_element_type=f32)
             + wmat("mfc1_b", 1, 32))
    movie = (jnp.dot(jnp.concatenate([movie, comments], axis=1),
                     wmat("mfc2_w", 32 + C, 32), preferred_element_type=f32)
             + wmat("mfc2_b", 1, 32))
    movie = (jnp.dot(movie, wmat("mfc3_w", 32, 16), preferred_element_type=f32)
             + wmat("mfc3_b", 1, 16))

    # ---- rating head ---------------------------------------------------------
    ret = jnp.sum(movie * user, axis=-1, keepdims=True)          # (B, 1)
    out_ref[...] = jax.nn.sigmoid(ret) * 5.0


# ------------------------------ parameter init --------------------------------
def init_params(key):
    def nrm(k, shape, scale=0.1):
        return (scale * jax.random.normal(k, shape)).astype(jnp.float32)

    keys = iter(jax.random.split(key, 64))
    E, K, C = EMBED_DIM, KERNEL_NUM, MOVIE_COMMENTS_DIM
    p = {}
    # embedding tables
    p["soc_table"] = nrm(next(keys), (SOCIALTYPE_MAX + 1, E))
    p["uid_table"] = nrm(next(keys), (UID_MAX + 1, E))
    p["mtyp_table"] = nrm(next(keys), (MOVIE_TYPES_MAX + 2, E))
    p["mid_table"] = nrm(next(keys), (MOVIE_ID_MAX + 1, E))
    p["ctok_table"] = nrm(next(keys), (MOVIE_CTOKENS_MAX + 2, E))
    # TextCnn convs: weight stored as (ws, E, K) per window ((in, out) layout)
    p["conv_w"] = [nrm(next(keys), (ws, E, K)) for ws in WINDOW_SIZES]
    p["conv_b"] = [nrm(next(keys), (1, K)) for _ in WINDOW_SIZES]
    # TextCnn fc: (len(ws)*K, C) split per window
    p["tfc_w"] = [nrm(next(keys), (K, C)) for _ in WINDOW_SIZES]
    p["tfc_b"] = nrm(next(keys), (1, C))
    # user tower
    p["ufc1_w"] = [nrm(next(keys), (E, 32)), nrm(next(keys), (E, 32))]
    p["ufc1_b"] = nrm(next(keys), (1, 32))
    p["ufc2_w"] = nrm(next(keys), (32, 16))
    p["ufc2_b"] = nrm(next(keys), (1, 16))
    # movie tower
    p["mfc1_w"] = [nrm(next(keys), (E, 32)), nrm(next(keys), (E, 32))]
    p["mfc1_b"] = nrm(next(keys), (1, 32))
    p["mfc2_w"] = [nrm(next(keys), (32, 32)), nrm(next(keys), (C, 32))]
    p["mfc2_b"] = nrm(next(keys), (1, 32))
    p["mfc3_w"] = nrm(next(keys), (32, 16))
    p["mfc3_b"] = nrm(next(keys), (1, 16))
    return p


# --------------------------- host-side slab packing ---------------------------
def pack_slab(params):
    mats = {
        "conv_w": jnp.concatenate([params["conv_w"][w][i]
                                   for w, ws in enumerate(WINDOW_SIZES)
                                   for i in range(ws)], axis=1),      # (E, 72)
        "conv_b": jnp.concatenate(params["conv_b"], axis=1),          # (1, 24)
        "tfc_w": jnp.concatenate(params["tfc_w"], axis=0),            # (24, C)
        "tfc_b": params["tfc_b"],
        "ufc1_w": jnp.concatenate(params["ufc1_w"], axis=0),          # (2E, 32)
        "ufc1_b": params["ufc1_b"],
        "ufc2_w": params["ufc2_w"],
        "ufc2_b": params["ufc2_b"],
        "mfc1_w": jnp.concatenate(params["mfc1_w"], axis=0),          # (2E, 32)
        "mfc1_b": params["mfc1_b"],
        "mfc2_w": jnp.concatenate(params["mfc2_w"], axis=0),          # (32+C, 32)
        "mfc2_b": params["mfc2_b"],
        "mfc3_w": params["mfc3_w"],
        "mfc3_b": params["mfc3_b"],
        "soc_table": params["soc_table"],
        "uid_table": params["uid_table"],
        "mtyp_table": params["mtyp_table"],
        "mid_table": params["mid_table"],
        "ctok_table": params["ctok_table"],
    }
    slab = jnp.zeros((SLAB_ROWS, LANES), jnp.float32)
    for name, (r, c) in _SLAB_SPEC:
        mat = mats[name]
        assert mat.shape == (r, c), (name, mat.shape, (r, c))
        slab = slab.at[SLAB_OFFS[name]:SLAB_OFFS[name] + r, :c].set(
            mat.astype(jnp.float32))
    return slab


# --------------------------------- wrapper ------------------------------------
@jax.jit
def model_forward(slab, user_ids, user_socialtype, movie_ids, movie_types,
                  movie_comments):
    B = user_ids.shape[0]
    smem = pl.BlockSpec(memory_space=pltpu.MemorySpace.SMEM)
    vmem = pl.BlockSpec(memory_space=pltpu.MemorySpace.VMEM)
    out = pl.pallas_call(
        model_kernel,
        out_shape=jax.ShapeDtypeStruct((B, 1), jnp.float32),
        in_specs=[smem, smem, smem, smem, smem, vmem],
        out_specs=vmem,
        scratch_shapes=[pltpu.VMEM((B * COMMENT_LEN, EMBED_DIM), jnp.float32)],
    )(user_ids.astype(jnp.int32),
      user_socialtype.astype(jnp.int32),
      movie_ids.astype(jnp.int32),
      movie_types.astype(jnp.int32),
      movie_comments.astype(jnp.int32),
      slab)
    return jnp.squeeze(out, axis=-1)                              # (B,)


# ------------------------- pure-JAX reference (check) -------------------------
def reference_forward(params, user_ids, user_socialtype, movie_ids, movie_types,
                      movie_comments):
    uid_e = params["uid_table"][user_ids].squeeze(1)
    soc_e = params["soc_table"][user_socialtype].squeeze(1)
    mid_e = params["mid_table"][movie_ids].squeeze(1)
    mtyp = params["mtyp_table"][movie_types].sum(axis=1)
    com = params["ctok_table"][movie_comments]
    B, L, E = com.shape

    pooled = []
    for w, b in zip(params["conv_w"], params["conv_b"]):
        ws, _, K = w.shape
        outs = []
        for t in range(L - ws + 1):
            win = com[:, t:t + ws, :].reshape(B, ws * E)
            outs.append(jnp.maximum(win @ w.reshape(ws * E, K) + b, 0.0))
        pooled.append(jnp.max(jnp.stack(outs, 0), axis=0))
    comments = (jnp.concatenate(pooled, 1)
                @ jnp.concatenate(params["tfc_w"], 0) + params["tfc_b"])

    user = (jnp.concatenate([uid_e, soc_e], 1)
            @ jnp.concatenate(params["ufc1_w"], 0) + params["ufc1_b"])
    user = user @ params["ufc2_w"] + params["ufc2_b"]

    movie = (jnp.concatenate([mtyp, mid_e], 1)
             @ jnp.concatenate(params["mfc1_w"], 0) + params["mfc1_b"])
    movie = (jnp.concatenate([movie, comments], 1)
             @ jnp.concatenate(params["mfc2_w"], 0) + params["mfc2_b"])
    movie = movie @ params["mfc3_w"] + params["mfc3_b"]

    return jax.nn.sigmoid(jnp.sum(movie * user, axis=-1)) * 5.0


# ----------------------------------- main --------------------------------------
if __name__ == "__main__":
    key = jax.random.PRNGKey(0)
    pkey, k1, k2, k3, k4, k5 = jax.random.split(key, 6)
    params = init_params(pkey)
    slab = jax.block_until_ready(pack_slab(params))   # one-time host-side packing

    user_ids = jax.random.randint(k1, (BATCH, 1), 0, UID_MAX + 1)
    user_socialtype = jax.random.randint(k2, (BATCH, 1), 0, SOCIALTYPE_MAX + 1)
    movie_ids = jax.random.randint(k3, (BATCH, 1), 0, MOVIE_ID_MAX + 1)
    movie_types = jax.random.randint(k4, (BATCH, N_MOVIE_TYPES), 0, MOVIE_TYPES_MAX + 2)
    movie_comments = jax.random.randint(k5, (BATCH, COMMENT_LEN), 0, MOVIE_CTOKENS_MAX + 2)

    out = model_forward(slab, user_ids, user_socialtype, movie_ids,
                        movie_types, movie_comments)
    out = jax.block_until_ready(out)

    ref = reference_forward(params, user_ids, user_socialtype, movie_ids,
                            movie_types, movie_comments)
    assert out.shape == (BATCH,)
    assert jnp.allclose(out, ref, atol=1e-4, rtol=1e-4), (out, ref)
    print("KERNEL_OK")
</pallas_src>

<mosaic_0001>
module attributes {stable_mosaic.version = 11 : i64} {
  func.func @model_kernel(%arg0: memref<2x1xi32, #tpu.memory_space<smem>>, %arg1: memref<2x1xi32, #tpu.memory_space<smem>>, %arg2: memref<2x1xi32, #tpu.memory_space<smem>>, %arg3: memref<2x4xi32, #tpu.memory_space<smem>>, %arg4: memref<2x12xi32, #tpu.memory_space<smem>>, %arg5: memref<512x128xf32, #tpu.memory_space<vmem>>, %arg6: memref<2x1xf32, #tpu.memory_space<vmem>>, %arg7: memref<24x16xf32, #tpu.memory_space<vmem>>) attributes {dimension_semantics = [], scalar_prefetch = 0 : i64, scratch_operands = 1 : i64, tpu.core_type = #tpu.core_type<tc>} {
    %c0 = arith.constant 0 : index
    %c0_0 = arith.constant 0 : index
    %0 = memref.load %arg4[%c0, %c0_0] : memref<2x12xi32, #tpu.memory_space<smem>>
    %c408_i32 = arith.constant 408 : i32
    %1 = arith.addi %c408_i32, %0 : i32
    %2 = arith.index_cast %1 : i32 to index
    %c0_1 = arith.constant 0 : index
    %3 = vector.load %arg5[%2, %c0_1] : memref<512x128xf32, #tpu.memory_space<vmem>>, vector<1x16xf32>
    %c0_2 = arith.constant 0 : index
    %c0_3 = arith.constant 0 : index
    %4 = vector.load %arg7[%c0_2, %c0_3] : memref<24x16xf32, #tpu.memory_space<vmem>>, vector<1x16xf32>
    tpu.vector_store %arg7[%c0_2, %c0_3], %3 {strides = array<i32>} : memref<24x16xf32, #tpu.memory_space<vmem>>, vector<1x16xf32>,
    %c0_4 = arith.constant 0 : index
    %c1 = arith.constant 1 : index
    %5 = memref.load %arg4[%c0_4, %c1] : memref<2x12xi32, #tpu.memory_space<smem>>
    %c408_i32_5 = arith.constant 408 : i32
    %6 = arith.addi %c408_i32_5, %5 : i32
    %7 = arith.index_cast %6 : i32 to index
    %c0_6 = arith.constant 0 : index
    %8 = vector.load %arg5[%7, %c0_6] : memref<512x128xf32, #tpu.memory_space<vmem>>, vector<1x16xf32>
    %c1_7 = arith.constant 1 : index
    %c0_8 = arith.constant 0 : index
    %9 = vector.load %arg7[%c1_7, %c0_8] : memref<24x16xf32, #tpu.memory_space<vmem>>, vector<1x16xf32>
    tpu.vector_store %arg7[%c1_7, %c0_8], %8 {strides = array<i32>} : memref<24x16xf32, #tpu.memory_space<vmem>>, vector<1x16xf32>,
    %c0_9 = arith.constant 0 : index
    %c2 = arith.constant 2 : index
    %10 = memref.load %arg4[%c0_9, %c2] : memref<2x12xi32, #tpu.memory_space<smem>>
    %c408_i32_10 = arith.constant 408 : i32
    %11 = arith.addi %c408_i32_10, %10 : i32
    %12 = arith.index_cast %11 : i32 to index
    %c0_11 = arith.constant 0 : index
    %13 = vector.load %arg5[%12, %c0_11] : memref<512x128xf32, #tpu.memory_space<vmem>>, vector<1x16xf32>
    %c2_12 = arith.constant 2 : index
    %c0_13 = arith.constant 0 : index
    %14 = vector.load %arg7[%c2_12, %c0_13] : memref<24x16xf32, #tpu.memory_space<vmem>>, vector<1x16xf32>
    tpu.vector_store %arg7[%c2_12, %c0_13], %13 {strides = array<i32>} : memref<24x16xf32, #tpu.memory_space<vmem>>, vector<1x16xf32>,
    %c0_14 = arith.constant 0 : index
    %c3 = arith.constant 3 : index
    %15 = memref.load %arg4[%c0_14, %c3] : memref<2x12xi32, #tpu.memory_space<smem>>
    %c408_i32_15 = arith.constant 408 : i32
    %16 = arith.addi %c408_i32_15, %15 : i32
    %17 = arith.index_cast %16 : i32 to index
    %c0_16 = arith.constant 0 : index
    %18 = vector.load %arg5[%17, %c0_16] : memref<512x128xf32, #tpu.memory_space<vmem>>, vector<1x16xf32>
    %c3_17 = arith.constant 3 : index
    %c0_18 = arith.constant 0 : index
    %19 = vector.load %arg7[%c3_17, %c0_18] : memref<24x16xf32, #tpu.memory_space<vmem>>, vector<1x16xf32>
    tpu.vector_store %arg7[%c3_17, %c0_18], %18 {strides = array<i32>} : memref<24x16xf32, #tpu.memory_space<vmem>>, vector<1x16xf32>,
    %c0_19 = arith.constant 0 : index
    %c4 = arith.constant 4 : index
    %20 = memref.load %arg4[%c0_19, %c4] : memref<2x12xi32, #tpu.memory_space<smem>>
    %c408_i32_20 = arith.constant 408 : i32
    %21 = arith.addi %c408_i32_20, %20 : i32
    %22 = arith.index_cast %21 : i32 to index
    %c0_21 = arith.constant 0 : index
    %23 = vector.load %arg5[%22, %c0_21] : memref<512x128xf32, #tpu.memory_space<vmem>>, vector<1x16xf32>
    %c4_22 = arith.constant 4 : index
    %c0_23 = arith.constant 0 : index
    %24 = vector.load %arg7[%c4_22, %c0_23] : memref<24x16xf32, #tpu.memory_space<vmem>>, vector<1x16xf32>
    tpu.vector_store %arg7[%c4_22, %c0_23], %23 {strides = array<i32>} : memref<24x16xf32, #tpu.memory_space<vmem>>, vector<1x16xf32>,
    %c0_24 = arith.constant 0 : index
    %c5 = arith.constant 5 : index
    %25 = memref.load %arg4[%c0_24, %c5] : memref<2x12xi32, #tpu.memory_space<smem>>
    %c408_i32_25 = arith.constant 408 : i32
    %26 = arith.addi %c408_i32_25, %25 : i32
    %27 = arith.index_cast %26 : i32 to index
    %c0_26 = arith.constant 0 : index
    %28 = vector.load %arg5[%27, %c0_26] : memref<512x128xf32, #tpu.memory_space<vmem>>, vector<1x16xf32>
    %c5_27 = arith.constant 5 : index
    %c0_28 = arith.constant 0 : index
    %29 = vector.load %arg7[%c5_27, %c0_28] : memref<24x16xf32, #tpu.memory_space<vmem>>, vector<1x16xf32>
    tpu.vector_store %arg7[%c5_27, %c0_28], %28 {strides = array<i32>} : memref<24x16xf32, #tpu.memory_space<vmem>>, vector<1x16xf32>,
    %c0_29 = arith.constant 0 : index
    %c6 = arith.constant 6 : index
    %30 = memref.load %arg4[%c0_29, %c6] : memref<2x12xi32, #tpu.memory_space<smem>>
    %c408_i32_30 = arith.constant 408 : i32
    %31 = arith.addi %c408_i32_30, %30 : i32
    %32 = arith.index_cast %31 : i32 to index
    %c0_31 = arith.constant 0 : index
    %33 = vector.load %arg5[%32, %c0_31] : memref<512x128xf32, #tpu.memory_space<vmem>>, vector<1x16xf32>
    %c6_32 = arith.constant 6 : index
    %c0_33 = arith.constant 0 : index
    %34 = vector.load %arg7[%c6_32, %c0_33] : memref<24x16xf32, #tpu.memory_space<vmem>>, vector<1x16xf32>
    tpu.vector_store %arg7[%c6_32, %c0_33], %33 {strides = array<i32>} : memref<24x16xf32, #tpu.memory_space<vmem>>, vector<1x16xf32>,
    %c0_34 = arith.constant 0 : index
    %c7 = arith.constant 7 : index
    %35 = memref.load %arg4[%c0_34, %c7] : memref<2x12xi32, #tpu.memory_space<smem>>
    %c408_i32_35 = arith.constant 408 : i32
    %36 = arith.addi %c408_i32_35, %35 : i32
    %37 = arith.index_cast %36 : i32 to index
    %c0_36 = arith.constant 0 : index
    %38 = vector.load %arg5[%37, %c0_36] : memref<512x128xf32, #tpu.memory_space<vmem>>, vector<1x16xf32>
    %c7_37 = arith.constant 7 : index
    %c0_38 = arith.constant 0 : index
    %39 = vector.load %arg7[%c7_37, %c0_38] : memref<24x16xf32, #tpu.memory_space<vmem>>, vector<1x16xf32>
    tpu.vector_store %arg7[%c7_37, %c0_38], %38 {strides = array<i32>} : memref<24x16xf32, #tpu.memory_space<vmem>>, vector<1x16xf32>,
    %c0_39 = arith.constant 0 : index
    %c8 = arith.constant 8 : index
    %40 = memref.load %arg4[%c0_39, %c8] : memref<2x12xi32, #tpu.memory_space<smem>>
    %c408_i32_40 = arith.constant 408 : i32
    %41 = arith.addi %c408_i32_40, %40 : i32
    %42 = arith.index_cast %41 : i32 to index
    %c0_41 = arith.constant 0 : index
    %43 = vector.load %arg5[%42, %c0_41] : memref<512x128xf32, #tpu.memory_space<vmem>>, vector<1x16xf32>
    %c8_42 = arith.constant 8 : index
    %c0_43 = arith.constant 0 : index
    %44 = vector.load %arg7[%c8_42, %c0_43] : memref<24x16xf32, #tpu.memory_space<vmem>>, vector<1x16xf32>
    tpu.vector_store %arg7[%c8_42, %c0_43], %43 {strides = array<i32>} : memref<24x16xf32, #tpu.memory_space<vmem>>, vector<1x16xf32>,
    %c0_44 = arith.constant 0 : index
    %c9 = arith.constant 9 : index
    %45 = memref.load %arg4[%c0_44, %c9] : memref<2x12xi32, #tpu.memory_space<smem>>
    %c408_i32_45 = arith.constant 408 : i32
    %46 = arith.addi %c408_i32_45, %45 : i32
    %47 = arith.index_cast %46 : i32 to index
    %c0_46 = arith.constant 0 : index
    %48 = vector.load %arg5[%47, %c0_46] : memref<512x128xf32, #tpu.memory_space<vmem>>, vector<1x16xf32>
    %c9_47 = arith.constant 9 : index
    %c0_48 = arith.constant 0 : index
    %49 = vector.load %arg7[%c9_47, %c0_48] : memref<24x16xf32, #tpu.memory_space<vmem>>, vector<1x16xf32>
    tpu.vector_store %arg7[%c9_47, %c0_48], %48 {strides = array<i32>} : memref<24x16xf32, #tpu.memory_space<vmem>>, vector<1x16xf32>,
    %c0_49 = arith.constant 0 : index
    %c10 = arith.constant 10 : index
    %50 = memref.load %arg4[%c0_49, %c10] : memref<2x12xi32, #tpu.memory_space<smem>>
    %c408_i32_50 = arith.constant 408 : i32
    %51 = arith.addi %c408_i32_50, %50 : i32
    %52 = arith.index_cast %51 : i32 to index
    %c0_51 = arith.constant 0 : index
    %53 = vector.load %arg5[%52, %c0_51] : memref<512x128xf32, #tpu.memory_space<vmem>>, vector<1x16xf32>
    %c10_52 = arith.constant 10 : index
    %c0_53 = arith.constant 0 : index
    %54 = vector.load %arg7[%c10_52, %c0_53] : memref<24x16xf32, #tpu.memory_space<vmem>>, vector<1x16xf32>
    tpu.vector_store %arg7[%c10_52, %c0_53], %53 {strides = array<i32>} : memref<24x16xf32, #tpu.memory_space<vmem>>, vector<1x16xf32>,
    %c0_54 = arith.constant 0 : index
    %c11 = arith.constant 11 : index
    %55 = memref.load %arg4[%c0_54, %c11] : memref<2x12xi32, #tpu.memory_space<smem>>
    %c408_i32_55 = arith.constant 408 : i32
    %56 = arith.addi %c408_i32_55, %55 : i32
    %57 = arith.index_cast %56 : i32 to index
    %c0_56 = arith.constant 0 : index
    %58 = vector.load %arg5[%57, %c0_56] : memref<512x128xf32, #tpu.memory_space<vmem>>, vector<1x16xf32>
    %c11_57 = arith.constant 11 : index
    %c0_58 = arith.constant 0 : index
    %59 = vector.load %arg7[%c11_57, %c0_58] : memref<24x16xf32, #tpu.memory_space<vmem>>, vector<1x16xf32>
    tpu.vector_store %arg7[%c11_57, %c0_58], %58 {strides = array<i32>} : memref<24x16xf32, #tpu.memory_space<vmem>>, vector<1x16xf32>,
    %c1_59 = arith.constant 1 : index
    %c0_60 = arith.constant 0 : index
    %60 = memref.load %arg4[%c1_59, %c0_60] : memref<2x12xi32, #tpu.memory_space<smem>>
    %c408_i32_61 = arith.constant 408 : i32
    %61 = arith.addi %c408_i32_61, %60 : i32
    %62 = arith.index_cast %61 : i32 to index
    %c0_62 = arith.constant 0 : index
    %63 = vector.load %arg5[%62, %c0_62] : memref<512x128xf32, #tpu.memory_space<vmem>>, vector<1x16xf32>
    %c12 = arith.constant 12 : index
    %c0_63 = arith.constant 0 : index
    %64 = vector.load %arg7[%c12, %c0_63] : memref<24x16xf32, #tpu.memory_space<vmem>>, vector<1x16xf32>
    tpu.vector_store %arg7[%c12, %c0_63], %63 {strides = array<i32>} : memref<24x16xf32, #tpu.memory_space<vmem>>, vector<1x16xf32>,
    %c1_64 = arith.constant 1 : index
    %c1_65 = arith.constant 1 : index
    %65 = memref.load %arg4[%c1_64, %c1_65] : memref<2x12xi32, #tpu.memory_space<smem>>
    %c408_i32_66 = arith.constant 408 : i32
    %66 = arith.addi %c408_i32_66, %65 : i32
    %67 = arith.index_cast %66 : i32 to index
    %c0_67 = arith.constant 0 : index
    %68 = vector.load %arg5[%67, %c0_67] : memref<512x128xf32, #tpu.memory_space<vmem>>, vector<1x16xf32>
    %c13 = arith.constant 13 : index
    %c0_68 = arith.constant 0 : index
    %69 = vector.load %arg7[%c13, %c0_68] : memref<24x16xf32, #tpu.memory_space<vmem>>, vector<1x16xf32>
    tpu.vector_store %arg7[%c13, %c0_68], %68 {strides = array<i32>} : memref<24x16xf32, #tpu.memory_space<vmem>>, vector<1x16xf32>,
    %c1_69 = arith.constant 1 : index
    %c2_70 = arith.constant 2 : index
    %70 = memref.load %arg4[%c1_69, %c2_70] : memref<2x12xi32, #tpu.memory_space<smem>>
    %c408_i32_71 = arith.constant 408 : i32
    %71 = arith.addi %c408_i32_71, %70 : i32
    %72 = arith.index_cast %71 : i32 to index
    %c0_72 = arith.constant 0 : index
    %73 = vector.load %arg5[%72, %c0_72] : memref<512x128xf32, #tpu.memory_space<vmem>>, vector<1x16xf32>
    %c14 = arith.constant 14 : index
    %c0_73 = arith.constant 0 : index
    %74 = vector.load %arg7[%c14, %c0_73] : memref<24x16xf32, #tpu.memory_space<vmem>>, vector<1x16xf32>
    tpu.vector_store %arg7[%c14, %c0_73], %73 {strides = array<i32>} : memref<24x16xf32, #tpu.memory_space<vmem>>, vector<1x16xf32>,
    %c1_74 = arith.constant 1 : index
    %c3_75 = arith.constant 3 : index
    %75 = memref.load %arg4[%c1_74, %c3_75] : memref<2x12xi32, #tpu.memory_space<smem>>
    %c408_i32_76 = arith.constant 408 : i32
    %76 = arith.addi %c408_i32_76, %75 : i32
    %77 = arith.index_cast %76 : i32 to index
    %c0_77 = arith.constant 0 : index
    %78 = vector.load %arg5[%77, %c0_77] : memref<512x128xf32, #tpu.memory_space<vmem>>, vector<1x16xf32>
    %c15 = arith.constant 15 : index
    %c0_78 = arith.constant 0 : index
    %79 = vector.load %arg7[%c15, %c0_78] : memref<24x16xf32, #tpu.memory_space<vmem>>, vector<1x16xf32>
    tpu.vector_store %arg7[%c15, %c0_78], %78 {strides = array<i32>} : memref<24x16xf32, #tpu.memory_space<vmem>>, vector<1x16xf32>,
    %c1_79 = arith.constant 1 : index
    %c4_80 = arith.constant 4 : index
    %80 = memref.load %arg4[%c1_79, %c4_80] : memref<2x12xi32, #tpu.memory_space<smem>>
    %c408_i32_81 = arith.constant 408 : i32
    %81 = arith.addi %c408_i32_81, %80 : i32
    %82 = arith.index_cast %81 : i32 to index
    %c0_82 = arith.constant 0 : index
    %83 = vector.load %arg5[%82, %c0_82] : memref<512x128xf32, #tpu.memory_space<vmem>>, vector<1x16xf32>
    %c16 = arith.constant 16 : index
    %c0_83 = arith.constant 0 : index
    %84 = vector.load %arg7[%c16, %c0_83] : memref<24x16xf32, #tpu.memory_space<vmem>>, vector<1x16xf32>
    tpu.vector_store %arg7[%c16, %c0_83], %83 {strides = array<i32>} : memref<24x16xf32, #tpu.memory_space<vmem>>, vector<1x16xf32>,
    %c1_84 = arith.constant 1 : index
    %c5_85 = arith.constant 5 : index
    %85 = memref.load %arg4[%c1_84, %c5_85] : memref<2x12xi32, #tpu.memory_space<smem>>
    %c408_i32_86 = arith.constant 408 : i32
    %86 = arith.addi %c408_i32_86, %85 : i32
    %87 = arith.index_cast %86 : i32 to index
    %c0_87 = arith.constant 0 : index
    %88 = vector.load %arg5[%87, %c0_87] : memref<512x128xf32, #tpu.memory_space<vmem>>, vector<1x16xf32>
    %c17 = arith.constant 17 : index
    %c0_88 = arith.constant 0 : index
    %89 = vector.load %arg7[%c17, %c0_88] : memref<24x16xf32, #tpu.memory_space<vmem>>, vector<1x16xf32>
    tpu.vector_store %arg7[%c17, %c0_88], %88 {strides = array<i32>} : memref<24x16xf32, #tpu.memory_space<vmem>>, vector<1x16xf32>,
    %c1_89 = arith.constant 1 : index
    %c6_90 = arith.constant 6 : index
    %90 = memref.load %arg4[%c1_89, %c6_90] : memref<2x12xi32, #tpu.memory_space<smem>>
    %c408_i32_91 = arith.constant 408 : i32
    %91 = arith.addi %c408_i32_91, %90 : i32
    %92 = arith.index_cast %91 : i32 to index
    %c0_92 = arith.constant 0 : index
    %93 = vector.load %arg5[%92, %c0_92] : memref<512x128xf32, #tpu.memory_space<vmem>>, vector<1x16xf32>
    %c18 = arith.constant 18 : index
    %c0_93 = arith.constant 0 : index
    %94 = vector.load %arg7[%c18, %c0_93] : memref<24x16xf32, #tpu.memory_space<vmem>>, vector<1x16xf32>
    tpu.vector_store %arg7[%c18, %c0_93], %93 {strides = array<i32>} : memref<24x16xf32, #tpu.memory_space<vmem>>, vector<1x16xf32>,
    %c1_94 = arith.constant 1 : index
    %c7_95 = arith.constant 7 : index
    %95 = memref.load %arg4[%c1_94, %c7_95] : memref<2x12xi32, #tpu.memory_space<smem>>
    %c408_i32_96 = arith.constant 408 : i32
    %96 = arith.addi %c408_i32_96, %95 : i32
    %97 = arith.index_cast %96 : i32 to index
    %c0_97 = arith.constant 0 : index
    %98 = vector.load %arg5[%97, %c0_97] : memref<512x128xf32, #tpu.memory_space<vmem>>, vector<1x16xf32>
    %c19 = arith.constant 19 : index
    %c0_98 = arith.constant 0 : index
    %99 = vector.load %arg7[%c19, %c0_98] : memref<24x16xf32, #tpu.memory_space<vmem>>, vector<1x16xf32>
    tpu.vector_store %arg7[%c19, %c0_98], %98 {strides = array<i32>} : memref<24x16xf32, #tpu.memory_space<vmem>>, vector<1x16xf32>,
    %c1_99 = arith.constant 1 : index
    %c8_100 = arith.constant 8 : index
    %100 = memref.load %arg4[%c1_99, %c8_100] : memref<2x12xi32, #tpu.memory_space<smem>>
    %c408_i32_101 = arith.constant 408 : i32
    %101 = arith.addi %c408_i32_101, %100 : i32
    %102 = arith.index_cast %101 : i32 to index
    %c0_102 = arith.constant 0 : index
    %103 = vector.load %arg5[%102, %c0_102] : memref<512x128xf32, #tpu.memory_space<vmem>>, vector<1x16xf32>
    %c20 = arith.constant 20 : index
    %c0_103 = arith.constant 0 : index
    %104 = vector.load %arg7[%c20, %c0_103] : memref<24x16xf32, #tpu.memory_space<vmem>>, vector<1x16xf32>
    tpu.vector_store %arg7[%c20, %c0_103], %103 {strides = array<i32>} : memref<24x16xf32, #tpu.memory_space<vmem>>, vector<1x16xf32>,
    %c1_104 = arith.constant 1 : index
    %c9_105 = arith.constant 9 : index
    %105 = memref.load %arg4[%c1_104, %c9_105] : memref<2x12xi32, #tpu.memory_space<smem>>
    %c408_i32_106 = arith.constant 408 : i32
    %106 = arith.addi %c408_i32_106, %105 : i32
    %107 = arith.index_cast %106 : i32 to index
    %c0_107 = arith.constant 0 : index
    %108 = vector.load %arg5[%107, %c0_107] : memref<512x128xf32, #tpu.memory_space<vmem>>, vector<1x16xf32>
    %c21 = arith.constant 21 : index
    %c0_108 = arith.constant 0 : index
    %109 = vector.load %arg7[%c21, %c0_108] : memref<24x16xf32, #tpu.memory_space<vmem>>, vector<1x16xf32>
    tpu.vector_store %arg7[%c21, %c0_108], %108 {strides = array<i32>} : memref<24x16xf32, #tpu.memory_space<vmem>>, vector<1x16xf32>,
    %c1_109 = arith.constant 1 : index
    %c10_110 = arith.constant 10 : index
    %110 = memref.load %arg4[%c1_109, %c10_110] : memref<2x12xi32, #tpu.memory_space<smem>>
    %c408_i32_111 = arith.constant 408 : i32
    %111 = arith.addi %c408_i32_111, %110 : i32
    %112 = arith.index_cast %111 : i32 to index
    %c0_112 = arith.constant 0 : index
    %113 = vector.load %arg5[%112, %c0_112] : memref<512x128xf32, #tpu.memory_space<vmem>>, vector<1x16xf32>
    %c22 = arith.constant 22 : index
    %c0_113 = arith.constant 0 : index
    %114 = vector.load %arg7[%c22, %c0_113] : memref<24x16xf32, #tpu.memory_space<vmem>>, vector<1x16xf32>
    tpu.vector_store %arg7[%c22, %c0_113], %113 {strides = array<i32>} : memref<24x16xf32, #tpu.memory_space<vmem>>, vector<1x16xf32>,
    %c1_114 = arith.constant 1 : index
    %c11_115 = arith.constant 11 : index
    %115 = memref.load %arg4[%c1_114, %c11_115] : memref<2x12xi32, #tpu.memory_space<smem>>
    %c408_i32_116 = arith.constant 408 : i32
    %116 = arith.addi %c408_i32_116, %115 : i32
    %117 = arith.index_cast %116 : i32 to index
    %c0_117 = arith.constant 0 : index
    %118 = vector.load %arg5[%117, %c0_117] : memref<512x128xf32, #tpu.memory_space<vmem>>, vector<1x16xf32>
    %c23 = arith.constant 23 : index
    %c0_118 = arith.constant 0 : index
    %119 = vector.load %arg7[%c23, %c0_118] : memref<24x16xf32, #tpu.memory_space<vmem>>, vector<1x16xf32>
    tpu.vector_store %arg7[%c23, %c0_118], %118 {strides = array<i32>} : memref<24x16xf32, #tpu.memory_space<vmem>>, vector<1x16xf32>,
    %c0_119 = arith.constant 0 : index
    %c0_120 = arith.constant 0 : index
    %120 = memref.load %arg0[%c0_119, %c0_120] : memref<2x1xi32, #tpu.memory_space<smem>>
    %c272_i32 = arith.constant 272 : i32
    %121 = arith.addi %c272_i32, %120 : i32
    %122 = arith.index_cast %121 : i32 to index
    %c0_121 = arith.constant 0 : index
    %123 = vector.load %arg5[%122, %c0_121] : memref<512x128xf32, #tpu.memory_space<vmem>>, vector<1x16xf32>
    %c1_122 = arith.constant 1 : index
    %c0_123 = arith.constant 0 : index
    %124 = memref.load %arg0[%c1_122, %c0_123] : memref<2x1xi32, #tpu.memory_space<smem>>
    %c272_i32_124 = arith.constant 272 : i32
    %125 = arith.addi %c272_i32_124, %124 : i32
    %126 = arith.index_cast %125 : i32 to index
    %c0_125 = arith.constant 0 : index
    %127 = vector.load %arg5[%126, %c0_125] : memref<512x128xf32, #tpu.memory_space<vmem>>, vector<1x16xf32>
    %128 = tpu.concatenate %123, %127 in 0 : vector<1x16xf32>, vector<1x16xf32> -> vector<2x16xf32>
    %c0_126 = arith.constant 0 : index
    %c0_127 = arith.constant 0 : index
    %129 = memref.load %arg1[%c0_126, %c0_127] : memref<2x1xi32, #tpu.memory_space<smem>>
    %c264_i32 = arith.constant 264 : i32
    %130 = arith.addi %c264_i32, %129 : i32
    %131 = arith.index_cast %130 : i32 to index
    %c0_128 = arith.constant 0 : index
    %132 = vector.load %arg5[%131, %c0_128] : memref<512x128xf32, #tpu.memory_space<vmem>>, vector<1x16xf32>
    %c1_129 = arith.constant 1 : index
    %c0_130 = arith.constant 0 : index
    %133 = memref.load %arg1[%c1_129, %c0_130] : memref<2x1xi32, #tpu.memory_space<smem>>
    %c264_i32_131 = arith.constant 264 : i32
    %134 = arith.addi %c264_i32_131, %133 : i32
    %135 = arith.index_cast %134 : i32 to index
    %c0_132 = arith.constant 0 : index
    %136 = vector.load %arg5[%135, %c0_132] : memref<512x128xf32, #tpu.memory_space<vmem>>, vector<1x16xf32>
    %137 = tpu.concatenate %132, %136 in 0 : vector<1x16xf32>, vector<1x16xf32> -> vector<2x16xf32>
    %c0_133 = arith.constant 0 : index
    %c0_134 = arith.constant 0 : index
    %138 = memref.load %arg2[%c0_133, %c0_134] : memref<2x1xi32, #tpu.memory_space<smem>>
    %c344_i32 = arith.constant 344 : i32
    %139 = arith.addi %c344_i32, %138 : i32
    %140 = arith.index_cast %139 : i32 to index
    %c0_135 = arith.constant 0 : index
    %141 = vector.load %arg5[%140, %c0_135] : memref<512x128xf32, #tpu.memory_space<vmem>>, vector<1x16xf32>
    %c1_136 = arith.constant 1 : index
    %c0_137 = arith.constant 0 : index
    %142 = memref.load %arg2[%c1_136, %c0_137] : memref<2x1xi32, #tpu.memory_space<smem>>
    %c344_i32_138 = arith.constant 344 : i32
    %143 = arith.addi %c344_i32_138, %142 : i32
    %144 = arith.index_cast %143 : i32 to index
    %c0_139 = arith.constant 0 : index
    %145 = vector.load %arg5[%144, %c0_139] : memref<512x128xf32, #tpu.memory_space<vmem>>, vector<1x16xf32>
    %146 = tpu.concatenate %141, %145 in 0 : vector<1x16xf32>, vector<1x16xf32> -> vector<2x16xf32>
    %c0_140 = arith.constant 0 : index
    %c0_141 = arith.constant 0 : index
    %147 = memref.load %arg3[%c0_140, %c0_141] : memref<2x4xi32, #tpu.memory_space<smem>>
    %c328_i32 = arith.constant 328 : i32
    %148 = arith.addi %c328_i32, %147 : i32
    %149 = arith.index_cast %148 : i32 to index
    %c0_142 = arith.constant 0 : index
    %150 = vector.load %arg5[%149, %c0_142] : memref<512x128xf32, #tpu.memory_space<vmem>>, vector<1x16xf32>
    %c0_143 = arith.constant 0 : index
    %c1_144 = arith.constant 1 : index
    %151 = memref.load %arg3[%c0_143, %c1_144] : memref<2x4xi32, #tpu.memory_space<smem>>
    %c328_i32_145 = arith.constant 328 : i32
    %152 = arith.addi %c328_i32_145, %151 : i32
    %153 = arith.index_cast %152 : i32 to index
    %c0_146 = arith.constant 0 : index
    %154 = vector.load %arg5[%153, %c0_146] : memref<512x128xf32, #tpu.memory_space<vmem>>, vector<1x16xf32>
    %155 = arith.addf %150, %154 : vector<1x16xf32>
    %c0_147 = arith.constant 0 : index
    %c2_148 = arith.constant 2 : index
    %156 = memref.load %arg3[%c0_147, %c2_148] : memref<2x4xi32, #tpu.memory_space<smem>>
    %c328_i32_149 = arith.constant 328 : i32
    %157 = arith.addi %c328_i32_149, %156 : i32
    %158 = arith.index_cast %157 : i32 to index
    %c0_150 = arith.constant 0 : index
    %159 = vector.load %arg5[%158, %c0_150] : memref<512x128xf32, #tpu.memory_space<vmem>>, vector<1x16xf32>
    %160 = arith.addf %155, %159 : vector<1x16xf32>
    %c0_151 = arith.constant 0 : index
    %c3_152 = arith.constant 3 : index
    %161 = memref.load %arg3[%c0_151, %c3_152] : memref<2x4xi32, #tpu.memory_space<smem>>
    %c328_i32_153 = arith.constant 328 : i32
    %162 = arith.addi %c328_i32_153, %161 : i32
    %163 = arith.index_cast %162 : i32 to index
    %c0_154 = arith.constant 0 : index
    %164 = vector.load %arg5[%163, %c0_154] : memref<512x128xf32, #tpu.memory_space<vmem>>, vector<1x16xf32>
    %165 = arith.addf %160, %164 : vector<1x16xf32>
    %c1_155 = arith.constant 1 : index
    %c0_156 = arith.constant 0 : index
    %166 = memref.load %arg3[%c1_155, %c0_156] : memref<2x4xi32, #tpu.memory_space<smem>>
    %c328_i32_157 = arith.constant 328 : i32
    %167 = arith.addi %c328_i32_157, %166 : i32
    %168 = arith.index_cast %167 : i32 to index
    %c0_158 = arith.constant 0 : index
    %169 = vector.load %arg5[%168, %c0_158] : memref<512x128xf32, #tpu.memory_space<vmem>>, vector<1x16xf32>
    %c1_159 = arith.constant 1 : index
    %c1_160 = arith.constant 1 : index
    %170 = memref.load %arg3[%c1_159, %c1_160] : memref<2x4xi32, #tpu.memory_space<smem>>
    %c328_i32_161 = arith.constant 328 : i32
    %171 = arith.addi %c328_i32_161, %170 : i32
    %172 = arith.index_cast %171 : i32 to index
    %c0_162 = arith.constant 0 : index
    %173 = vector.load %arg5[%172, %c0_162] : memref<512x128xf32, #tpu.memory_space<vmem>>, vector<1x16xf32>
    %174 = arith.addf %169, %173 : vector<1x16xf32>
    %c1_163 = arith.constant 1 : index
    %c2_164 = arith.constant 2 : index
    %175 = memref.load %arg3[%c1_163, %c2_164] : memref<2x4xi32, #tpu.memory_space<smem>>
    %c328_i32_165 = arith.constant 328 : i32
    %176 = arith.addi %c328_i32_165, %175 : i32
    %177 = arith.index_cast %176 : i32 to index
    %c0_166 = arith.constant 0 : index
    %178 = vector.load %arg5[%177, %c0_166] : memref<512x128xf32, #tpu.memory_space<vmem>>, vector<1x16xf32>
    %179 = arith.addf %174, %178 : vector<1x16xf32>
    %c1_167 = arith.constant 1 : index
    %c3_168 = arith.constant 3 : index
    %180 = memref.load %arg3[%c1_167, %c3_168] : memref<2x4xi32, #tpu.memory_space<smem>>
    %c328_i32_169 = arith.constant 328 : i32
    %181 = arith.addi %c328_i32_169, %180 : i32
    %182 = arith.index_cast %181 : i32 to index
    %c0_170 = arith.constant 0 : index
    %183 = vector.load %arg5[%182, %c0_170] : memref<512x128xf32, #tpu.memory_space<vmem>>, vector<1x16xf32>
    %184 = arith.addf %179, %183 : vector<1x16xf32>
    %185 = tpu.concatenate %165, %184 in 0 : vector<1x16xf32>, vector<1x16xf32> -> vector<2x16xf32>
    %c0_171 = arith.constant 0 : index
    %c0_172 = arith.constant 0 : index
    %186 = vector.load %arg5[%c0_171, %c0_172] : memref<512x128xf32, #tpu.memory_space<vmem>>, vector<16x72xf32>
    %c16_173 = arith.constant 16 : index
    %c0_174 = arith.constant 0 : index
    %187 = vector.load %arg5[%c16_173, %c0_174] : memref<512x128xf32, #tpu.memory_space<vmem>>, vector<1x24xf32>
    %c0_175 = arith.constant 0 : index
    %c0_176 = arith.constant 0 : index
    %188 = vector.load %arg7[%c0_175, %c0_176] : memref<24x16xf32, #tpu.memory_space<vmem>>, vector<24x16xf32>
    %cst = arith.constant dense<0.000000e+00> : vector<24x72xf32>
    %189 = tpu.matmul %188, %186, %cst {dimension_numbers = #tpu.dot_dimension_numbers<[1], [0], [0], [1], [0, 0, 1, 1], [], []>} : vector<24x16xf32>, vector<16x72xf32>, vector<24x72xf32> -> vector<24x72xf32>
    %190 = vector.extract_strided_slice %189 {offsets = [0, 0], sizes = [11, 8], strides = [1, 1]} : vector<24x72xf32> to vector<11x8xf32>
    %191 = vector.extract_strided_slice %189 {offsets = [1, 8], sizes = [11, 8], strides = [1, 1]} : vector<24x72xf32> to vector<11x8xf32>
    %192 = arith.addf %190, %191 : vector<11x8xf32>
    %193 = vector.extract_strided_slice %187 {offsets = [0, 0], sizes = [1, 8], strides = [1, 1]} : vector<1x24xf32> to vector<1x8xf32>
    %194 = vector.broadcast %193 : vector<1x8xf32> to vector<11x8xf32>
    %195 = arith.addf %192, %194 : vector<11x8xf32>
    %cst_177 = arith.constant 0.000000e+00 : f32
    %196 = vector.broadcast %cst_177 : f32 to vector<11x8xf32>
    %197 = arith.maximumf %195, %196 : vector<11x8xf32>
    %cst_178 = arith.constant dense<0xFF800000> : vector<8xf32>
    %198 = vector.multi_reduction <maximumf>, %197, %cst_178 [0] : vector<11x8xf32> to vector<8xf32>
    %199 = vector.shape_cast %198 : vector<8xf32> to vector<1x8xf32>
    %200 = vector.extract_strided_slice %189 {offsets = [0, 16], sizes = [10, 8], strides = [1, 1]} : vector<24x72xf32> to vector<10x8xf32>
    %201 = vector.extract_strided_slice %189 {offsets = [1, 24], sizes = [10, 8], strides = [1, 1]} : vector<24x72xf32> to vector<10x8xf32>
    %202 = arith.addf %200, %201 : vector<10x8xf32>
    %203 = vector.extract_strided_slice %189 {offsets = [2, 32], sizes = [10, 8], strides = [1, 1]} : vector<24x72xf32> to vector<10x8xf32>
    %204 = arith.addf %202, %203 : vector<10x8xf32>
    %205 = vector.extract_strided_slice %187 {offsets = [0, 8], sizes = [1, 8], strides = [1, 1]} : vector<1x24xf32> to vector<1x8xf32>
    %206 = vector.broadcast %205 : vector<1x8xf32> to vector<10x8xf32>
    %207 = arith.addf %204, %206 : vector<10x8xf32>
    %cst_179 = arith.constant 0.000000e+00 : f32
    %208 = vector.broadcast %cst_179 : f32 to vector<10x8xf32>
    %209 = arith.maximumf %207, %208 : vector<10x8xf32>
    %cst_180 = arith.constant dense<0xFF800000> : vector<8xf32>
    %210 = vector.multi_reduction <maximumf>, %209, %cst_180 [0] : vector<10x8xf32> to vector<8xf32>
    %211 = vector.shape_cast %210 : vector<8xf32> to vector<1x8xf32>
    %212 = vector.extract_strided_slice %189 {offsets = [0, 40], sizes = [9, 8], strides = [1, 1]} : vector<24x72xf32> to vector<9x8xf32>
    %213 = vector.extract_strided_slice %189 {offsets = [1, 48], sizes = [9, 8], strides = [1, 1]} : vector<24x72xf32> to vector<9x8xf32>
    %214 = arith.addf %212, %213 : vector<9x8xf32>
    %215 = vector.extract_strided_slice %189 {offsets = [2, 56], sizes = [9, 8], strides = [1, 1]} : vector<24x72xf32> to vector<9x8xf32>
    %216 = arith.addf %214, %215 : vector<9x8xf32>
    %217 = vector.extract_strided_slice %189 {offsets = [3, 64], sizes = [9, 8], strides = [1, 1]} : vector<24x72xf32> to vector<9x8xf32>
    %218 = arith.addf %216, %217 : vector<9x8xf32>
    %219 = vector.extract_strided_slice %187 {offsets = [0, 16], sizes = [1, 8], strides = [1, 1]} : vector<1x24xf32> to vector<1x8xf32>
    %220 = vector.broadcast %219 : vector<1x8xf32> to vector<9x8xf32>
    %221 = arith.addf %218, %220 : vector<9x8xf32>
    %cst_181 = arith.constant 0.000000e+00 : f32
    %222 = vector.broadcast %cst_181 : f32 to vector<9x8xf32>
    %223 = arith.maximumf %221, %222 : vector<9x8xf32>
    %cst_182 = arith.constant dense<0xFF800000> : vector<8xf32>
    %224 = vector.multi_reduction <maximumf>, %223, %cst_182 [0] : vector<9x8xf32> to vector<8xf32>
    %225 = vector.shape_cast %224 : vector<8xf32> to vector<1x8xf32>
    %226 = tpu.concatenate %199, %211, %225 in 1 : vector<1x8xf32>, vector<1x8xf32>, vector<1x8xf32> -> vector<1x24xf32>
    %227 = vector.extract_strided_slice %189 {offsets = [12, 0], sizes = [11, 8], strides = [1, 1]} : vector<24x72xf32> to vector<11x8xf32>
    %228 = vector.extract_strided_slice %189 {offsets = [13, 8], sizes = [11, 8], strides = [1, 1]} : vector<24x72xf32> to vector<11x8xf32>
    %229 = arith.addf %227, %228 : vector<11x8xf32>
    %230 = vector.extract_strided_slice %187 {offsets = [0, 0], sizes = [1, 8], strides = [1, 1]} : vector<1x24xf32> to vector<1x8xf32>
    %231 = vector.broadcast %230 : vector<1x8xf32> to vector<11x8xf32>
    %232 = arith.addf %229, %231 : vector<11x8xf32>
    %cst_183 = arith.constant 0.000000e+00 : f32
    %233 = vector.broadcast %cst_183 : f32 to vector<11x8xf32>
    %234 = arith.maximumf %232, %233 : vector<11x8xf32>
    %cst_184 = arith.constant dense<0xFF800000> : vector<8xf32>
    %235 = vector.multi_reduction <maximumf>, %234, %cst_184 [0] : vector<11x8xf32> to vector<8xf32>
    %236 = vector.shape_cast %235 : vector<8xf32> to vector<1x8xf32>
    %237 = vector.extract_strided_slice %189 {offsets = [12, 16], sizes = [10, 8], strides = [1, 1]} : vector<24x72xf32> to vector<10x8xf32>
    %238 = vector.extract_strided_slice %189 {offsets = [13, 24], sizes = [10, 8], strides = [1, 1]} : vector<24x72xf32> to vector<10x8xf32>
    %239 = arith.addf %237, %238 : vector<10x8xf32>
    %240 = vector.extract_strided_slice %189 {offsets = [14, 32], sizes = [10, 8], strides = [1, 1]} : vector<24x72xf32> to vector<10x8xf32>
    %241 = arith.addf %239, %240 : vector<10x8xf32>
    %242 = vector.extract_strided_slice %187 {offsets = [0, 8], sizes = [1, 8], strides = [1, 1]} : vector<1x24xf32> to vector<1x8xf32>
    %243 = vector.broadcast %242 : vector<1x8xf32> to vector<10x8xf32>
    %244 = arith.addf %241, %243 : vector<10x8xf32>
    %cst_185 = arith.constant 0.000000e+00 : f32
    %245 = vector.broadcast %cst_185 : f32 to vector<10x8xf32>
    %246 = arith.maximumf %244, %245 : vector<10x8xf32>
    %cst_186 = arith.constant dense<0xFF800000> : vector<8xf32>
    %247 = vector.multi_reduction <maximumf>, %246, %cst_186 [0] : vector<10x8xf32> to vector<8xf32>
    %248 = vector.shape_cast %247 : vector<8xf32> to vector<1x8xf32>
    %249 = vector.extract_strided_slice %189 {offsets = [12, 40], sizes = [9, 8], strides = [1, 1]} : vector<24x72xf32> to vector<9x8xf32>
    %250 = vector.extract_strided_slice %189 {offsets = [13, 48], sizes = [9, 8], strides = [1, 1]} : vector<24x72xf32> to vector<9x8xf32>
    %251 = arith.addf %249, %250 : vector<9x8xf32>
    %252 = vector.extract_strided_slice %189 {offsets = [14, 56], sizes = [9, 8], strides = [1, 1]} : vector<24x72xf32> to vector<9x8xf32>
    %253 = arith.addf %251, %252 : vector<9x8xf32>
    %254 = vector.extract_strided_slice %189 {offsets = [15, 64], sizes = [9, 8], strides = [1, 1]} : vector<24x72xf32> to vector<9x8xf32>
    %255 = arith.addf %253, %254 : vector<9x8xf32>
    %256 = vector.extract_strided_slice %187 {offsets = [0, 16], sizes = [1, 8], strides = [1, 1]} : vector<1x24xf32> to vector<1x8xf32>
    %257 = vector.broadcast %256 : vector<1x8xf32> to vector<9x8xf32>
    %258 = arith.addf %255, %257 : vector<9x8xf32>
    %cst_187 = arith.constant 0.000000e+00 : f32
    %259 = vector.broadcast %cst_187 : f32 to vector<9x8xf32>
    %260 = arith.maximumf %258, %259 : vector<9x8xf32>
    %cst_188 = arith.constant dense<0xFF800000> : vector<8xf32>
    %261 = vector.multi_reduction <maximumf>, %260, %cst_188 [0] : vector<9x8xf32> to vector<8xf32>
    %262 = vector.shape_cast %261 : vector<8xf32> to vector<1x8xf32>
    %263 = tpu.concatenate %236, %248, %262 in 1 : vector<1x8xf32>, vector<1x8xf32>, vector<1x8xf32> -> vector<1x24xf32>
    %264 = tpu.concatenate %226, %263 in 0 : vector<1x24xf32>, vector<1x24xf32> -> vector<2x24xf32>
    %c24 = arith.constant 24 : index
    %c0_189 = arith.constant 0 : index
    %265 = vector.load %arg5[%c24, %c0_189] : memref<512x128xf32, #tpu.memory_space<vmem>>, vector<24x8xf32>
    %cst_190 = arith.constant dense<0.000000e+00> : vector<2x8xf32>
    %266 = tpu.matmul %264, %265, %cst_190 {dimension_numbers = #tpu.dot_dimension_numbers<[1], [0], [0], [1], [0, 0, 1, 1], [], []>} : vector<2x24xf32>, vector<24x8xf32>, vector<2x8xf32> -> vector<2x8xf32>
    %c48 = arith.constant 48 : index
    %c0_191 = arith.constant 0 : index
    %267 = vector.load %arg5[%c48, %c0_191] : memref<512x128xf32, #tpu.memory_space<vmem>>, vector<1x8xf32>
    %268 = vector.broadcast %267 : vector<1x8xf32> to vector<2x8xf32>
    %269 = arith.addf %266, %268 : vector<2x8xf32>
    %270 = tpu.concatenate %128, %137 in 1 : vector<2x16xf32>, vector<2x16xf32> -> vector<2x32xf32>
    %c56 = arith.constant 56 : index
    %c0_192 = arith.constant 0 : index
    %271 = vector.load %arg5[%c56, %c0_192] : memref<512x128xf32, #tpu.memory_space<vmem>>, vector<32x32xf32>
    %cst_193 = arith.constant dense<0.000000e+00> : vector<2x32xf32>
    %272 = tpu.matmul %270, %271, %cst_193 {dimension_numbers = #tpu.dot_dimension_numbers<[1], [0], [0], [1], [0, 0, 1, 1], [], []>} : vector<2x32xf32>, vector<32x32xf32>, vector<2x32xf32> -> vector<2x32xf32>
    %c88 = arith.constant 88 : index
    %c0_194 = arith.constant 0 : index
    %273 = vector.load %arg5[%c88, %c0_194] : memref<512x128xf32, #tpu.memory_space<vmem>>, vector<1x32xf32>
    %274 = vector.broadcast %273 : vector<1x32xf32> to vector<2x32xf32>
    %275 = arith.addf %272, %274 : vector<2x32xf32>
    %c96 = arith.constant 96 : index
    %c0_195 = arith.constant 0 : index
    %276 = vector.load %arg5[%c96, %c0_195] : memref<512x128xf32, #tpu.memory_space<vmem>>, vector<32x16xf32>
    %cst_196 = arith.constant dense<0.000000e+00> : vector<2x16xf32>
    %277 = tpu.matmul %275, %276, %cst_196 {dimension_numbers = #tpu.dot_dimension_numbers<[1], [0], [0], [1], [0, 0, 1, 1], [], []>} : vector<2x32xf32>, vector<32x16xf32>, vector<2x16xf32> -> vector<2x16xf32>
    %c128 = arith.constant 128 : index
    %c0_197 = arith.constant 0 : index
    %278 = vector.load %arg5[%c128, %c0_197] : memref<512x128xf32, #tpu.memory_space<vmem>>, vector<1x16xf32>
    %279 = vector.broadcast %278 : vector<1x16xf32> to vector<2x16xf32>
    %280 = arith.addf %277, %279 : vector<2x16xf32>
    %281 = tpu.concatenate %185, %146 in 1 : vector<2x16xf32>, vector<2x16xf32> -> vector<2x32xf32>
    %c136 = arith.constant 136 : index
    %c0_198 = arith.constant 0 : index
    %282 = vector.load %arg5[%c136, %c0_198] : memref<512x128xf32, #tpu.memory_space<vmem>>, vector<32x32xf32>
    %cst_199 = arith.constant dense<0.000000e+00> : vector<2x32xf32>
    %283 = tpu.matmul %281, %282, %cst_199 {dimension_numbers = #tpu.dot_dimension_numbers<[1], [0], [0], [1], [0, 0, 1, 1], [], []>} : vector<2x32xf32>, vector<32x32xf32>, vector<2x32xf32> -> vector<2x32xf32>
    %c168 = arith.constant 168 : index
    %c0_200 = arith.constant 0 : index
    %284 = vector.load %arg5[%c168, %c0_200] : memref<512x128xf32, #tpu.memory_space<vmem>>, vector<1x32xf32>
    %285 = vector.broadcast %284 : vector<1x32xf32> to vector<2x32xf32>
    %286 = arith.addf %283, %285 : vector<2x32xf32>
    %287 = tpu.concatenate %286, %269 in 1 : vector<2x32xf32>, vector<2x8xf32> -> vector<2x40xf32>
    %c176 = arith.constant 176 : index
    %c0_201 = arith.constant 0 : index
    %288 = vector.load %arg5[%c176, %c0_201] : memref<512x128xf32, #tpu.memory_space<vmem>>, vector<40x32xf32>
    %cst_202 = arith.constant dense<0.000000e+00> : vector<2x32xf32>
    %289 = tpu.matmul %287, %288, %cst_202 {dimension_numbers = #tpu.dot_dimension_numbers<[1], [0], [0], [1], [0, 0, 1, 1], [], []>} : vector<2x40xf32>, vector<40x32xf32>, vector<2x32xf32> -> vector<2x32xf32>
    %c216 = arith.constant 216 : index
    %c0_203 = arith.constant 0 : index
    %290 = vector.load %arg5[%c216, %c0_203] : memref<512x128xf32, #tpu.memory_space<vmem>>, vector<1x32xf32>
    %291 = vector.broadcast %290 : vector<1x32xf32> to vector<2x32xf32>
    %292 = arith.addf %289, %291 : vector<2x32xf32>
    %c224 = arith.constant 224 : index
    %c0_204 = arith.constant 0 : index
    %293 = vector.load %arg5[%c224, %c0_204] : memref<512x128xf32, #tpu.memory_space<vmem>>, vector<32x16xf32>
    %cst_205 = arith.constant dense<0.000000e+00> : vector<2x16xf32>
    %294 = tpu.matmul %292, %293, %cst_205 {dimension_numbers = #tpu.dot_dimension_numbers<[1], [0], [0], [1], [0, 0, 1, 1], [], []>} : vector<2x32xf32>, vector<32x16xf32>, vector<2x16xf32> -> vector<2x16xf32>
    %c256 = arith.constant 256 : index
    %c0_206 = arith.constant 0 : index
    %295 = vector.load %arg5[%c256, %c0_206] : memref<512x128xf32, #tpu.memory_space<vmem>>, vector<1x16xf32>
    %296 = vector.broadcast %295 : vector<1x16xf32> to vector<2x16xf32>
    %297 = arith.addf %294, %296 : vector<2x16xf32>
    %298 = arith.mulf %297, %280 : vector<2x16xf32>
    %cst_207 = arith.constant dense<0.000000e+00> : vector<2xf32>
    %299 = vector.multi_reduction <add>, %298, %cst_207 [1] : vector<2x16xf32> to vector<2xf32>
    %300 = vector.shape_cast %299 : vector<2xf32> to vector<2x1xf32>
    %301 = arith.negf %300 : vector<2x1xf32>
    %302 = math.exp %301 : vector<2x1xf32>
    %cst_208 = arith.constant 1.000000e+00 : f32
    %303 = vector.broadcast %cst_208 : f32 to vector<2x1xf32>
    %304 = arith.addf %303, %302 : vector<2x1xf32>
    %305 = arith.divf %303, %304 : vector<2x1xf32>
    %cst_209 = arith.constant 5.000000e+00 : f32
    %306 = vector.broadcast %cst_209 : f32 to vector<2x1xf32>
    %307 = arith.mulf %305, %306 : vector<2x1xf32>
    %c0_210 = arith.constant 0 : index
    %c0_211 = arith.constant 0 : index
    %308 = vector.load %arg6[%c0_210, %c0_211] : memref<2x1xf32, #tpu.memory_space<vmem>>, vector<2x1xf32>
    tpu.vector_store %arg6[%c0_210, %c0_211], %307 {strides = array<i32>} : memref<2x1xf32, #tpu.memory_space<vmem>>, vector<2x1xf32>,
    return
  }
}

</mosaic_0001>

<bundles_post_ra>
// kernel: model_forward.1
= control target key start
LH: loop header
LB: loop body
LE: loop exit
PB: predicated region body
PF: predicated region fallthrough
CT: control target
= control target key end

     0   :  { %11 = vsyncpa [#allocation5], 0  ;;  %s1194_s0 = inlined_call_operand.vmem [shape: s32[2,1], index: 0, kind: input, shape index: {}]   ;;  %s1195_s1 = inlined_call_operand.vmem [shape: s32[2,1], index: 1, kind: input, shape index: {}]   ;;  %s1196_s2 = inlined_call_operand.vmem [shape: s32[2,1], index: 2, kind: input, shape index: {}]   ;;  %s1197_s3 = inlined_call_operand.vmem [shape: s32[2,4], index: 3, kind: input, shape index: {}]   ;;  %s1198_s4 = inlined_call_operand.vmem [shape: s32[2,12], index: 4, kind: input, shape index: {}]   ;;  %s1199_s5 = inlined_call_operand.hbm [shape: f32[512,128], index: 5, kind: input, shape index: {}]   ;;  %s1200_s6 = inlined_call_operand.vmem [shape: f32[2,1], index: 6, kind: output, shape index: {}]  }
   0x1   :  { %12 = vsyncpa [#allocation7], 0 }
   0x2   :  { %13 = vsyncpa [#allocation10], 0  ;;  %s29_s23 = sshll.u32 %s1195_s1, 4  ;;  %s30_s23 = int_to_ptr.vmem [resolvable:$true] %s29_s23 }
   0x3   :  { %14 = vsyncpa [#allocation4], 0  ;;  %s47_s26 = sshll.u32 %s1197_s3, 4  ;;  %s1032_s27 = smov [#allocation6]   ;;  %s48_s26 = int_to_ptr.vmem [resolvable:$true] %s47_s26 }
   0x4   :  { %32 = dma.vmem_to_smem %s30_s23, 32, %s1032_s27, [#allocation7]  }
   0x5   :  { %s1033_s28 = smov [#allocation9]   ;;  %s20_s7 = sshll.u32 %s1194_s0, 4  ;;  %s21_s7 = int_to_ptr.vmem [resolvable:$true] %s20_s7 }
   0x6   :  { %50 = dma.vmem_to_smem %s48_s26, 32, %s1033_s28, [#allocation10]  }
   0x7   :  { %s38_s1 = sshll.u32 %s1196_s2, 4  ;;  %s1034_s10 = smov [#allocation3]   ;;  %s39_s1 = int_to_ptr.vmem [resolvable:$true] %s38_s1 }
   0x8   :  { %23 = dma.vmem_to_smem %s21_s7, 32, %s1034_s10, [#allocation5]  }
   0x9   :  { %s1035_s11 = smov [#allocation8]   ;;  %s56_s13 = sshll.u32 %s1198_s4, 4  ;;  %s57_s13 = int_to_ptr.vmem [resolvable:$true] %s56_s13 }
   0xa   :  { %41 = dma.vmem_to_smem %s39_s1, 32, %s1035_s11, [#allocation7]  }
   0xb   :  { %s64_s16 = sshll.u32 %s1199_s5, 4  ;;  %s1036_s0 = smov [#allocation11]   ;;  %s65_s16 = int_to_ptr.hbm [resolvable:$true] %s64_s16 }
   0xc   :  { %59 = dma.vmem_to_smem %s57_s13, 32, %s1036_s0, [#allocation10]  }
   0xd   :  { %s1037_s17 = smov [#allocation12]   ;;  %s1038_s2 = smov 128  }
   0xe   :  { %s66_s18 = sshll.u32 %s1037_s17, 4  ;;  %s1039_s19 = smov 8   ;;  %s67_s18 = int_to_ptr.vmem [resolvable:$true] %s66_s18 }
   0xf   :  { %72 = dma.hbm_to_vmem [thread:$0]  %s65_s16, 8192, %s67_s18, [#allocation4], %s1038_s2, %s1038_s2, %s1039_s19  }
  0x10   :  { %1024 = dma.done.wait [#allocation5], 32  }
  0x11   :  { %1025 = vsyncadd [#allocation5], 4294967264 }
  0x12   :  { %1026 = dma.done.wait [#allocation7], 64  }
  0x13   :  { %1027 = vsyncadd [#allocation7], 4294967232 }
  0x14   :  { %1028 = dma.done.wait [#allocation10], 64  }
  0x15   :  { %1029 = vsyncadd [#allocation10], 4294967232 }
  0x16   :  { %1030 = dma.done.wait [#allocation4], 8192  }
  0x17   :  { %1031 = vsyncadd [#allocation4], 4294959104 }
  0x18   :  { %97 = sfence }
  0x19   :  { %v299_v0 = vld [vmem:[#allocation12 + $0x8] sm:$0xff]  ;;  %v298_v1 = vld [vmem:[#allocation12] sm:$0xff]  ;;  %s98_s4 = sld [smem:[#allocation11]]  ;;  %vm102_vm0 = vcmask 122880   ;;  %vm304_vm1 = vcmask 130048   ;;  %vm370_vm2 = vcmask 1045504  }
  0x1a   :  { %328 = vmatpush.msra.mxu0 %v299_v0  ;;  %s835_s5 = sld [smem:[#allocation11 + $0x1]]  ;;  %v1127_v29 = vld [vmem:[#allocation12 + $0x10] ss:$0 sm:$0xff]  ;;  %vm342_vm3 = vcmask 1046528   ;;  %vm401_vm4 = vcmask 1044480   ;;  %vm361_vm5 = vcmask 59392  }
  0x1b   :  { %s837_s20 = sld [smem:[#allocation11 + $0x2]]  ;;  %383 = vrot.lane.b32.xlu1 %v1127_v29, %s1039_s19  ;;  %s1042_s19 = smov 104   ;;  %vm359_vm6 = vcmask 64512   ;;  %vm392_vm7 = vcmask 189568   ;;  %vm390_vm8 = vcmask 195712   ;;  %vm458_vm9 = vcmask 63488  }
  0x1c   :  { %329 = vmatpush.msra.mxu0 %v298_v1  ;;  %s839_s21 = sld [smem:[#allocation11 + $0x3]]  ;;  %vm483_vm10 = vcmask 193664   ;;  %vm456_vm11 = vcmask 64516   ;;  %vm481_vm12 = vcmask 195716   ;;  %vm508_vm13 = vcmask 389440  }
  0x1d   :  { %s841_s22 = sld [smem:[#allocation11 + $0x4]]  ;;  %vm506_vm14 = vcmask 392516   ;;  %vm420_vm15 = vcmask 392512  }
  0x1e   :  { %s843_s23 = sld [smem:[#allocation11 + $0x5]] }
  0x1f   :  { %s845_s24 = sld [smem:[#allocation11 + $0x6]]  ;;  %s758_s25 = scalar_lea.vmem [#allocation12], %s98_s4 }
  0x20   :  { %v834_v2 = vld [vmem:[%s758_s25 + $0x198] sm:$0x1]  ;;  %s847_s26 = sld [smem:[#allocation11 + $0x7]]  ;;  %s760_s27 = scalar_lea.vmem [#allocation12], %s835_s5 }
  0x21   :  { %103 = vst.msk [vmem:[#allocation2] sm:$0x1] %vm102_vm0, %v834_v2  ;;  %v836_v3 = vld [vmem:[%s760_s27 + $0x198] sm:$0x1]  ;;  %s762_s28 = scalar_lea.vmem [#allocation12], %s837_s20  ;;  %s849_s1 = sld [smem:[#allocation11 + $0x8]] }
  0x22   :  { %108 = vst.msk [vmem:[#allocation2 + $0x1] sm:$0x1] %vm102_vm0, %v836_v3  ;;  %v838_v4 = vld [vmem:[%s762_s28 + $0x198] sm:$0x1]  ;;  %s764_s29 = scalar_lea.vmem [#allocation12], %s839_s21  ;;  %s851_s10 = sld [smem:[#allocation11 + $0x9]] }
  0x23   :  { %113 = vst.msk [vmem:[#allocation2 + $0x2] sm:$0x1] %vm102_vm0, %v838_v4  ;;  %v840_v5 = vld [vmem:[%s764_s29 + $0x198] sm:$0x1]  ;;  %s766_s30 = scalar_lea.vmem [#allocation12], %s841_s22  ;;  %s853_s11 = sld [smem:[#allocation11 + $0xa]] }
  0x24   :  { %118 = vst.msk [vmem:[#allocation2 + $0x3] sm:$0x1] %vm102_vm0, %v840_v5  ;;  %v842_v6 = vld [vmem:[%s766_s30 + $0x198] sm:$0x1]  ;;  %s768_s7 = scalar_lea.vmem [#allocation12], %s843_s23  ;;  %s855_s3 = sld [smem:[#allocation11 + $0xb]] }
  0x25   :  { %123 = vst.msk [vmem:[#allocation2 + $0x4] sm:$0x1] %vm102_vm0, %v842_v6  ;;  %v844_v7 = vld [vmem:[%s768_s7 + $0x198] sm:$0x1]  ;;  %s770_s8 = scalar_lea.vmem [#allocation12], %s845_s24  ;;  %s857_s12 = sld [smem:[#allocation11 + $0x80]] }
  0x26   :  { %128 = vst.msk [vmem:[#allocation2 + $0x5] sm:$0x1] %vm102_vm0, %v844_v7  ;;  %v846_v8 = vld [vmem:[%s770_s8 + $0x198] sm:$0x1]  ;;  %s772_s9 = scalar_lea.vmem [#allocation12], %s847_s26  ;;  %s859_s13 = sld [smem:[#allocation11 + $0x81]] }
  0x27   :  { %133 = vst.msk [vmem:[#allocation2 + $0x6] sm:$0x1] %vm102_vm0, %v846_v8  ;;  %v848_v9 = vld [vmem:[%s772_s9 + $0x198] sm:$0x1]  ;;  %s861_s14 = sld [smem:[#allocation11 + $0x82]]  ;;  %s774_s15 = scalar_lea.vmem [#allocation12], %s849_s1 }
  0x28   :  { %138 = vst.msk [vmem:[#allocation2 + $0x7] sm:$0x1] %vm102_vm0, %v848_v9  ;;  %v850_v10 = vld [vmem:[%s774_s15 + $0x198] sm:$0x1]  ;;  %s863_s16 = sld [smem:[#allocation11 + $0x83]]  ;;  %s776_s0 = scalar_lea.vmem [#allocation12], %s851_s10 }
  0x29   :  { %143 = vst.msk [vmem:[#allocation2 + $0x8] sm:$0x1] %vm102_vm0, %v850_v10  ;;  %v852_v12 = vld [vmem:[%s776_s0 + $0x198] sm:$0x1]  ;;  %s778_s17 = scalar_lea.vmem [#allocation12], %s853_s11  ;;  %s865_s21 = sld [smem:[#allocation11 + $0x84]] }
  0x2a   :  { %148 = vst.msk [vmem:[#allocation2 + $0x9] sm:$0x1] %vm102_vm0, %v852_v12  ;;  %v854_v13 = vld [vmem:[%s778_s17 + $0x198] sm:$0x1]  ;;  %s780_s18 = scalar_lea.vmem [#allocation12], %s855_s3  ;;  %s867_s22 = sld [smem:[#allocation11 + $0x85]] }
  0x2b   :  { %153 = vst.msk [vmem:[#allocation2 + $0xa] sm:$0x1] %vm102_vm0, %v854_v13  ;;  %v856_v14 = vld [vmem:[%s780_s18 + $0x198] sm:$0x1]  ;;  %s782_s2 = scalar_lea.vmem [#allocation12], %s857_s12  ;;  %s869_s23 = sld [smem:[#allocation11 + $0x86]] }
  0x2c   :  { %158 = vst.msk [vmem:[#allocation2 + $0xb] sm:$0x1] %vm102_vm0, %v856_v14  ;;  %v858_v15 = vld [vmem:[%s782_s2 + $0x198] sm:$0x1]  ;;  %s784_s4 = scalar_lea.vmem [#allocation12], %s859_s13  ;;  %s871_s24 = sld [smem:[#allocation11 + $0x87]] }
  0x2d   :  { %163 = vst.msk [vmem:[#allocation2 + $0xc] sm:$0x1] %vm102_vm0, %v858_v15  ;;  %v860_v16 = vld [vmem:[%s784_s4 + $0x198] sm:$0x1]  ;;  %s786_s5 = scalar_lea.vmem [#allocation12], %s861_s14  ;;  %s873_s25 = sld [smem:[#allocation11 + $0x88]] }
  0x2e   :  { %168 = vst.msk [vmem:[#allocation2 + $0xd] sm:$0x1] %vm102_vm0, %v860_v16  ;;  %v862_v17 = vld [vmem:[%s786_s5 + $0x198] sm:$0x1]  ;;  %s788_s20 = scalar_lea.vmem [#allocation12], %s863_s16  ;;  %s875_s26 = sld [smem:[#allocation11 + $0x89]] }
  0x2f   :  { %v301_v11 = vld [vmem:[#allocation2] sm:$0xff]  ;;  %173 = vst.msk [vmem:[#allocation2 + $0xe] sm:$0x1] %vm102_vm0, %v862_v17  ;;  %v864_v18 = vld [vmem:[%s788_s20 + $0x198] sm:$0x1]  ;;  %s877_s27 = sld [smem:[#allocation11 + $0x8a]] }
  0x30   :  { %905 = vmatmul.msk.f32.vlgmr.msra.gmra.mxu0 %vm304_vm1, %v301_v11  ;;  %178 = vst.msk [vmem:[#allocation2 + $0xf] sm:$0x1] %vm102_vm0, %v864_v18  ;;  %s790_s28 = scalar_lea.vmem [#allocation12], %s865_s21  ;;  %s879_s29 = sld [smem:[#allocation11 + $0x8b]] }
  0x31   :  { %v866_v19 = vld [vmem:[%s790_s28 + $0x198] sm:$0x1]  ;;  %s792_s30 = scalar_lea.vmem [#allocation12], %s867_s22  ;;  %s794_s7 = scalar_lea.vmem [#allocation12], %s869_s23 }
  0x32   :  { %183 = vst.msk [vmem:[#allocation2 + $0x10] sm:$0x1] %vm102_vm0, %v866_v19  ;;  %v868_v21 = vld [vmem:[%s792_s30 + $0x198] sm:$0x1]  ;;  %s796_s8 = scalar_lea.vmem [#allocation12], %s871_s24  ;;  %s1040_s3 = smov 120  }
  0x33   :  { %188 = vst.msk [vmem:[#allocation2 + $0x11] sm:$0x1] %vm102_vm0, %v868_v21  ;;  %v870_v22 = vld [vmem:[%s794_s7 + $0x198] sm:$0x1]  ;;  %s798_s9 = scalar_lea.vmem [#allocation12], %s873_s25  ;;  %s1041_s12 = smov 112  }
  0x34   :  { %193 = vst.msk [vmem:[#allocation2 + $0x12] sm:$0x1] %vm102_vm0, %v870_v22  ;;  %v872_v23 = vld [vmem:[%s796_s8 + $0x198] sm:$0x1]  ;;  %s800_s1 = scalar_lea.vmem [#allocation12], %s875_s26  ;;  %s1043_s13 = smov 24  }
  0x35   :  { %198 = vst.msk [vmem:[#allocation2 + $0x13] sm:$0x1] %vm102_vm0, %v872_v23  ;;  %v874_v24 = vld [vmem:[%s798_s9 + $0x198] sm:$0x1]  ;;  %s802_s10 = scalar_lea.vmem [#allocation12], %s877_s27  ;;  %s888_s14 = sld [smem:[#allocation8 + $0x80]] }
  0x36   :  { %203 = vst.msk [vmem:[#allocation2 + $0x14] sm:$0x1] %vm102_vm0, %v874_v24  ;;  %v876_v25 = vld [vmem:[%s800_s1 + $0x198] sm:$0x1]  ;;  %s804_s11 = scalar_lea.vmem [#allocation12], %s879_s29  ;;  %s244_s15 = sld [smem:[#allocation8]] }
  0x37   :  { %v302_v20 = vld [vmem:[#allocation2 + $0x8] sm:$0xff]  ;;  %208 = vst.msk [vmem:[#allocation2 + $0x15] sm:$0x1] %vm102_vm0, %v876_v25  ;;  %v878_v26 = vld [vmem:[%s802_s10 + $0x198] sm:$0x1]  ;;  %s1044_s17 = smov 16  }
  0x38   :  { %906 = vmatmul.msk.f32.gmra.mxu0 %vm304_vm1, %v302_v20  ;;  %213 = vst.msk [vmem:[#allocation2 + $0x16] sm:$0x1] %vm102_vm0, %v878_v26  ;;  %v880_v27 = vld [vmem:[%s804_s11 + $0x198] sm:$0x1]  ;;  %s232_s18 = sld [smem:[#allocation6]] }
  0x39   :  { %218 = vst.msk [vmem:[#allocation2 + $0x17] sm:$0x1] %vm102_vm0, %v880_v27  ;;  %vm422_vm0 = vcmask 385344   ;;  %s885_s2 = sld [smem:[#allocation6 + $0x80]] }
  0x3a   :  { %s897_s4 = sld [smem:[#allocation9 + $0x80]] }
  0x3b   :  { %s816_s0 = scalar_lea.vmem [#allocation12], %s888_s14  ;;  %s899_s5 = sld [smem:[#allocation9 + $0x81]] }
  0x3c   :  { %s814_s16 = scalar_lea.vmem [#allocation12], %s244_s15  ;;  %s256_s20 = sld [smem:[#allocation9]] }
  0x3d   :  { %s891_s23 = sld [smem:[#allocation9 + $0x1]] }
  0x3e   :  { %s810_s21 = scalar_lea.vmem [#allocation12], %s232_s18  ;;  %s901_s24 = sld [smem:[#allocation9 + $0x82]] }
  0x3f   :  { %s812_s22 = scalar_lea.vmem [#allocation12], %s885_s2  ;;  %s893_s25 = sld [smem:[#allocation9 + $0x2]] }
  0x40   :  { %v303_v28 = vld [vmem:[#allocation2 + $0x10] sm:$0xff]  ;;  %s903_s26 = sld [smem:[#allocation9 + $0x83]]  ;;  %s826_s28 = scalar_lea.vmem [#allocation12], %s897_s4 }
  0x41   :  { %907 = vmatmul.msk.f32.gmra.mxu0 %vm304_vm1, %v303_v28  ;;  %s895_s27 = sld [smem:[#allocation9 + $0x3]]  ;;  %s828_s29 = scalar_lea.vmem [#allocation12], %s899_s5 }
  0x42   :  { %s818_s30 = scalar_lea.vmem [#allocation12], %s256_s20  ;;  %s882_s11 = sld [smem:[#allocation3 + $0x80]] }
  0x43   :  { %s820_s7 = scalar_lea.vmem [#allocation12], %s891_s23 }
  0x44   :  { %s830_s8 = scalar_lea.vmem [#allocation12], %s901_s24 }
  0x45   :  { %s822_s9 = scalar_lea.vmem [#allocation12], %s893_s25 }
  0x46   :  { %s832_s1 = scalar_lea.vmem [#allocation12], %s903_s26 }
  0x47   :  { %s824_s10 = scalar_lea.vmem [#allocation12], %s895_s27 }
  0x8d   :  { %v384_v48 = vpop.permute.xlu1 %383 }
  0xad   :  { %v331_v30 = vpop.f32.mrf.mxu0 }
  0xae   :  { %v371_v33 = vrot.slane %v331_v30, 2  ;;  %v343_v39 = vrot.slane %v331_v30, 1  ;;  %v402_v46 = vrot.slane %v331_v30, 3 }
  0xb5   :  { %v1131_v31 = vpop.f32.mrf.mxu0 }
  0xb6   :  { %v344_v32 = vrot.slane %v1131_v31, 1  ;;  %v372_v34 = vrot.slane %v1131_v31, 2  ;;  %v403_v43 = vrot.slane %v1131_v31, 3 }
  0xb8   :  { %348 = vrot.lane.b32.xlu1 %v344_v32, %s1040_s3  ;;  %v373_v35 = vsel %vm370_vm2, %v371_v33, %v372_v34  ;;  %v345_v40 = vsel %vm342_vm3, %v343_v39, %v344_v32  ;;  %v404_v47 = vsel %vm401_vm4, %v402_v46, %v403_v43 }
  0xb9   :  { %374 = vrot.lane.b32.xlu0 %v373_v35, %s1041_s12 }
  0xbe   :  { %v337_v36 = vpop.f32.mrf.mxu0 }
  0xbf   :  { %v442_v37 = vrot.slane %v337_v36, 1  ;;  %v467_v38 = vrot.slane %v337_v36, 2  ;;  %v492_v41 = vrot.slane %v337_v36, 3 }
  0xc0   :  { %376 = vrot.lane.b32.xlu1 %v372_v34, %s1041_s12 }
  0xc1   :  { %471 = vrot.lane.b32.xlu2 %v467_v38, %s1041_s12  ;;  %446 = vrot.lane.b32.xlu0 %v442_v37, %s1040_s3  ;;  %v468_v42 = vsel %vm370_vm2, %v372_v34, %v467_v38  ;;  %v493_v44 = vsel %vm401_vm4, %v403_v43, %v492_v41  ;;  %v443_v45 = vsel %vm342_vm3, %v344_v32, %v442_v37  ;;  %vm230_vm2 = vcmask 1040384  }
  0xc2   :  { %vm536_vm3 = vcmask 195584   ;;  %vm571_vm4 = vcmask 261120  }
  0xc8   :  { %346 = vrot.lane.b32.xlu1 %v345_v40, %s1040_s3 }
  0xc9   :  { %469 = vrot.lane.b32.xlu2 %v468_v42, %s1041_s12  ;;  %496 = vrot.lane.b32.xlu0 %v492_v41, %s1042_s19  ;;  %s219_s12 = sld [smem:[#allocation3]] }
  0xd0   :  { %413 = vrot.lane.b32.xlu1 %v1127_v29, %s1043_s13  ;;  %s806_s13 = scalar_lea.vmem [#allocation12], %s219_s12 }
  0xd1   :  { %494 = vrot.lane.b32.xlu2 %v493_v44, %s1042_s19  ;;  %444 = vrot.lane.b32.xlu0 %v443_v45, %s1040_s3 }
  0xd9   :  { %405 = vrot.lane.b32.xlu2 %v404_v47, %s1042_s19  ;;  %407 = vrot.lane.b32.xlu0 %v403_v43, %s1042_s19 }
 0x11b   :  { %v472_v50 = vpop.permute.xlu2 %471 }
 0x123   :  { %v470_v54 = vpop.permute.xlu2 %469 }
 0x12a   :  { %v349_v49 = vpop.permute.xlu1 %348 }
 0x12b   :  { %v375_v51 = vpop.permute.xlu0 %374  ;;  %v353_v53 = vadd.f32 %v349_v49, %v1131_v31  ;;  %v495_v5 = vpop.permute.xlu2 %494 }
 0x12d   :  { %v356_v57 = vadd.f32 %v1127_v29, %v353_v53 }
 0x12f   :  { %v358_v61 = vmax.f32 %v356_v57, 0.0 }
 0x131   :  { %v362_v4 = vsel %vm361_vm5, %v358_v61, -inf  ;;  %vm670_vm5 = vcmask 326656  }
 0x132   :  { %v377_v52 = vpop.permute.xlu1 %376 }
 0x133   :  { %v1150_v55 = vadd.f32 %v377_v52, %v353_v53  ;;  %v447_v56 = vpop.permute.xlu0 %446  ;;  %v406_v24 = vpop.permute.xlu2 %405 }
 0x134   :  { %v451_v6 = vadd.f32 %v447_v56, %v337_v36 }
 0x135   :  { %v387_v59 = vadd.f32 %v384_v48, %v1150_v55 }
 0x136   :  { %v476_v13 = vadd.f32 %v472_v50, %v451_v6  ;;  %v453_v14 = vadd.f32 %v1127_v29, %v451_v6 }
 0x137   :  { %v389_v0 = vmax.f32 %v387_v59, 0.0 }
 0x138   :  { %v478_v19 = vadd.f32 %v476_v13, %v384_v48  ;;  %v455_v22 = vmax.f32 %v453_v14, 0.0  ;;  %v889_v14 = vld [vmem:[%s816_s0 + $0x158] sm:$0x1] }
 0x139   :  { %v393_v10 = vsel %vm392_vm7, %v389_v0, -inf }
 0x13a   :  { %v347_v58 = vpop.permute.xlu1 %346  ;;  %v480_v32 = vmax.f32 %v478_v19, 0.0  ;;  %v459_v36 = vsel %vm458_vm9, %v455_v22, -inf  ;;  %v531_v19 = vld [vmem:[#allocation12 + $0x18] sm:$0xff]  ;;  %v630_v22 = vld [vmem:[#allocation12 + $0x90] sm:$0xff] }
 0x13b   :  { %v352_v60 = vadd.f32 %v347_v58, %v331_v30  ;;  %v497_v3 = vpop.permute.xlu0 %496 }
 0x13c   :  { %v501_v20 = vadd.f32 %v497_v3, %v476_v13  ;;  %v484_v44 = vsel %vm483_vm10, %v480_v32, -inf  ;;  %v887_v13 = vld [vmem:[%s814_s16 + $0x158] sm:$0x1]  ;;  %vm748_vm10 = vcmask 1024  }
 0x13d   :  { %v355_v62 = vadd.f32 %v1127_v29, %v352_v60  ;;  %v380_v63 = vadd.f32 %v375_v51, %v352_v60 }
 0x13f   :  { %v357_v1 = vmax.f32 %v355_v62, 0.0  ;;  %v386_v2 = vadd.f32 %v384_v48, %v380_v63  ;;  %v411_v28 = vadd.f32 %v406_v24, %v380_v63 }
 0x141   :  { %v388_v7 = vmax.f32 %v386_v2, 0.0  ;;  %v360_v8 = vsel %vm359_vm6, %v357_v1, -inf }
 0x142   :  { %v1156_v9 = vmax.f32 %v360_v8, %v362_v4  ;;  %v414_v16 = vpop.permute.xlu1 %413 }
 0x143   :  { %v391_v11 = vsel %vm390_vm8, %v388_v7, -inf  ;;  %v445_v17 = vpop.permute.xlu0 %444  ;;  %v503_v25 = vadd.f32 %v501_v20, %v414_v16  ;;  %v416_v37 = vadd.f32 %v414_v16, %v411_v28  ;;  %v632_v20 = vld [vmem:[#allocation12 + $0xa0] sm:$0xff] }
 0x144   :  { %v394_v12 = vmax.f32 %v391_v11, %v393_v10  ;;  %v450_v21 = vadd.f32 %v445_v17, %v1131_v31  ;;  %v533_v17 = vld [vmem:[#allocation12 + $0x28] sm:$0xff] }
 0x145   :  { %v505_v38 = vmax.f32 %v503_v25, 0.0  ;;  %v418_v49 = vmax.f32 %v416_v37, 0.0  ;;  %553 = vmatpush.msra.mxu1 %v533_v17  ;;  %v364_v25 = vrot.slane %v1156_v9, 4 }
 0x146   :  { %v395_v15 = vrot.slane %v394_v12, 4  ;;  %v452_v26 = vadd.f32 %v1127_v29, %v450_v21  ;;  %v475_v27 = vadd.f32 %v470_v54, %v450_v21  ;;  %v631_v21 = vld [vmem:[#allocation12 + $0x98] sm:$0xff] }
 0x147   :  { %v509_v50 = vsel %vm508_vm13, %v505_v38, -inf  ;;  %v421_v59 = vsel %vm420_vm15, %v418_v49, -inf  ;;  %v898_v49 = vld [vmem:[%s826_s28 + $0x148] sm:$0x1] }
 0x148   :  { %v396_v18 = vmax.f32 %v394_v12, %v395_v15  ;;  %v454_v33 = vmax.f32 %v452_v26, 0.0  ;;  %v477_v34 = vadd.f32 %v475_v27, %v384_v48  ;;  %v500_v35 = vadd.f32 %v495_v5, %v475_v27 }
 0x149   :  { %v253_v15 = vrot.slane %v889_v14, 7  ;;  %v365_v27 = vmax.f32 %v1156_v9, %v364_v25 }
 0x14a   :  { %v397_v23 = vrot.slane %v396_v18, 2  ;;  %v457_v39 = vsel %vm456_vm11, %v454_v33, -inf  ;;  %v479_v40 = vmax.f32 %v477_v34, 0.0  ;;  %v502_v41 = vadd.f32 %v500_v35, %v414_v16 }
 0x14b   :  { %v1161_v29 = vmax.f32 %v457_v39, %v459_v36  ;;  %v408_v42 = vpop.permute.xlu0 %407 }
 0x14c   :  { %v398_v30 = vmax.f32 %v396_v18, %v397_v23  ;;  %v482_v45 = vsel %vm481_vm12, %v479_v40, -inf  ;;  %v504_v46 = vmax.f32 %v502_v41, 0.0  ;;  %v412_v47 = vadd.f32 %v408_v42, %v1150_v55  ;;  %v532_v18 = vld [vmem:[#allocation12 + $0x20] sm:$0xff]  ;;  %v629_v23 = vld [vmem:[#allocation12 + $0x88] sm:$0xff] }
 0x14d   :  { %v485_v48 = vmax.f32 %v482_v45, %v484_v44  ;;  %554 = vmatpush.msra.mxu1 %v532_v18  ;;  %v461_v24 = vrot.slane %v1161_v29, 4  ;;  %v884_v45 = vld [vmem:[%s810_s21 + $0x108] sm:$0x1] }
 0x14e   :  { %v399_v31 = vrot.slane %v398_v30, 1  ;;  %v507_v51 = vsel %vm506_vm14, %v504_v46, -inf  ;;  %v417_v52 = vadd.f32 %v414_v16, %v412_v47  ;;  %v255_v16 = vsel %vm230_vm2, %v887_v13, %v253_v15  ;;  %v886_v46 = vld [vmem:[%s812_s22 + $0x108] sm:$0x1] }
 0x14f   :  { %v486_v53 = vrot.slane %v485_v48, 4  ;;  %v510_v54 = vmax.f32 %v507_v51, %v509_v50  ;;  %555 = vmatpush.msra.mxu1 %v531_v19  ;;  %v462_v26 = vmax.f32 %v1161_v29, %v461_v24  ;;  %v241_v47 = vrot.slane %v886_v46, 7  ;;  %v900_v50 = vld [vmem:[%s828_s29 + $0x148] sm:$0x1]  ;;  %v931_v24 = vld [vmem:[#allocation12 + $0xa8] ss:$0 sm:$0xff] }
 0x150   :  { %v400_v43 = vmax.f32 %v398_v30, %v399_v31  ;;  %v419_v56 = vmax.f32 %v417_v52, 0.0  ;;  %v366_v30 = vrot.slane %v365_v27, 2  ;;  %v283_v51 = vadd.f32 %v900_v50, %v898_v49  ;;  %v890_v52 = vld [vmem:[%s818_s30 + $0x148] sm:$0x1] }
 0x151   :  { %v487_v57 = vmax.f32 %v485_v48, %v486_v53  ;;  %v511_v58 = vrot.slane %v510_v54, 4  ;;  %650 = vmatpush.msrb.mxu1 %v632_v20  ;;  %v463_v28 = vrot.slane %v462_v26, 2  ;;  %v243_v48 = vsel %vm230_vm2, %v884_v45, %v241_v47  ;;  %v892_v53 = vld [vmem:[%s820_s7 + $0x148] sm:$0x1]  ;;  %v664_v20 = vld [vmem:[#allocation12 + $0xb8] sm:$0xff] }
 0x152   :  { %432 = vrot.lane.b32.xlu1 %v400_v43, %s1040_s3  ;;  %v423_v60 = vsel %vm422_vm0, %v419_v56, -inf  ;;  %v367_v33 = vmax.f32 %v365_v27, %v366_v30  ;;  %v264_v56 = vadd.f32 %v892_v53, %v890_v52  ;;  %v596_v30 = vld [vmem:[#allocation12 + $0x68] sm:$0xff] }
 0x153   :  { %v424_v61 = vmax.f32 %v421_v59, %v423_v60  ;;  %v488_v62 = vrot.slane %v487_v57, 2  ;;  %v512_v63 = vmax.f32 %v510_v54, %v511_v58  ;;  %651 = vmatpush.msrb.mxu1 %v631_v21  ;;  %v464_v32 = vmax.f32 %v462_v26, %v463_v28  ;;  %v902_v54 = vld [vmem:[%s830_s8 + $0x148] sm:$0x1] }
 0x154   :  { %v368_v36 = vrot.slane %v367_v33, 1  ;;  %v894_v58 = vld [vmem:[%s822_s9 + $0x148] sm:$0x1] }
 0x155   :  { %v425_v55 = vrot.slane %v424_v61, 4  ;;  %v489_v0 = vmax.f32 %v487_v57, %v488_v62  ;;  %v513_v1 = vrot.slane %v512_v63, 2  ;;  %652 = vmatpush.msrb.mxu1 %v630_v22  ;;  %v465_v35 = vrot.slane %v464_v32, 1  ;;  %v904_v59 = vld [vmem:[%s832_s1 + $0x148] sm:$0x1]  ;;  %v598_v22 = vld [vmem:[#allocation12 + $0x78] sm:$0xff] }
 0x156   :  { %v369_v38 = vmax.f32 %v367_v33, %v368_v36  ;;  %v288_v57 = vadd.f32 %v902_v54, %v283_v51  ;;  %v269_v60 = vadd.f32 %v894_v58, %v264_v56  ;;  %v896_v62 = vld [vmem:[%s824_s10 + $0x148] sm:$0x1]  ;;  %616 = vmatpush.msra.mxu3 %v598_v22  ;;  %v697_v33 = vld [vmem:[#allocation12 + $0xf8] sm:$0xff] }
 0x157   :  { %v490_v2 = vrot.slane %v489_v0, 1  ;;  %v514_v3 = vmax.f32 %v512_v63, %v513_v1  ;;  %v426_v4 = vmax.f32 %v424_v61, %v425_v55  ;;  %653 = vmatpush.msrb.mxu1 %v629_v23  ;;  %v466_v31 = vmax.f32 %v464_v32, %v465_v35  ;;  %v663_v21 = vld [vmem:[#allocation12 + $0xb0] sm:$0xff]  ;;  %v595_v32 = vld [vmem:[#allocation12 + $0x60] sm:$0xff]  ;;  %v695_v35 = vld [vmem:[#allocation12 + $0xe8] sm:$0xff] }
 0x158   :  { %v293_v61 = vadd.f32 %v904_v59, %v288_v57  ;;  %v274_v63 = vadd.f32 %v896_v62, %v269_v60  ;;  %v597_v23 = vld [vmem:[#allocation12 + $0x70] sm:$0xff]  ;;  %v932_v36 = vld [vmem:[#allocation12 + $0x58] ss:$0 sm:$0xff] }
 0x159   :  { %v491_v5 = vmax.f32 %v489_v0, %v490_v2  ;;  %v515_v6 = vrot.slane %v514_v3, 1  ;;  %v427_v7 = vrot.slane %v426_v4, 2  ;;  %617 = vmatpush.msra.mxu3 %v597_v23 }
 0x15a   :  { %561 = vrot.lane.b32.xlu1 %v243_v48, %s1044_s17  ;;  %v295_v55 = vrot.slane %v293_v61, 7 }
 0x15b   :  { %518 = vrot.lane.b32.xlu2 %v491_v5, %s1040_s3  ;;  %v516_v8 = vmax.f32 %v514_v3, %v515_v6  ;;  %v428_v10 = vmax.f32 %v426_v4, %v427_v7  ;;  %v568_v3 = vld [vmem:[#allocation12 + $0x50] sm:$0xff]  ;;  %v567_v4 = vld [vmem:[#allocation12 + $0x48] sm:$0xff]  ;;  %v566_v5 = vld [vmem:[#allocation12 + $0x40] sm:$0xff]  ;;  %s1045_s3 = smov 32   ;;  %618 = vmatpush.msra.mxu3 %v596_v30 }
 0x15c   :  { %v297_v0 = vsel %vm230_vm2, %v274_v63, %v295_v55  ;;  %587 = vmatpush.msra.mxu2 %v568_v3  ;;  %v565_v6 = vld [vmem:[#allocation12 + $0x38] sm:$0xff]  ;;  %v667_v7 = vld [vmem:[#allocation12 + $0xd0] sm:$0xff] }
 0x15d   :  { %522 = vrot.lane.b32.xlu0 %v516_v8, %s1042_s19  ;;  %v429_v11 = vrot.slane %v428_v10, 1  ;;  %v666_v8 = vld [vmem:[#allocation12 + $0xc8] sm:$0xff]  ;;  %619 = vmatpush.msra.mxu3 %v595_v32 }
 0x15e   :  { %588 = vmatpush.msra.mxu2 %v567_v4 }
 0x15f   :  { %v430_v12 = vmax.f32 %v428_v10, %v429_v11  ;;  %v665_v10 = vld [vmem:[#allocation12 + $0xc0] sm:$0xff]  ;;  %v930_v11 = vld [vmem:[#allocation12 + $0x30] ss:$0 sm:$0xff]  ;;  %715 = vmatpush.msrb.mxu3 %v697_v33 }
 0x160   :  { %589 = vmatpush.msra.mxu2 %v566_v5 }
 0x162   :  { %590 = vmatpush.msra.mxu2 %v565_v6 }
 0x163   :  { %436 = vrot.lane.b32.xlu2 %v430_v12, %s1042_s19  ;;  %s808_s19 = scalar_lea.vmem [#allocation12], %s882_s11 }
 0x164   :  { %685 = vmatpush.msrb.mxu2 %v667_v7  ;;  %v883_v14 = vld [vmem:[%s808_s19 + $0x110] sm:$0x1] }
 0x165   :  { %625 = vrot.lane.b32.xlu0 %v255_v16, %s1044_s17  ;;  %v228_v15 = vrot.slane %v883_v14, 7  ;;  %v881_v16 = vld [vmem:[%s806_s13 + $0x110] sm:$0x1] }
 0x166   :  { %686 = vmatpush.msrb.mxu2 %v666_v8 }
 0x167   :  { %v231_v17 = vsel %vm230_vm2, %v881_v16, %v228_v15 }
 0x168   :  { %687 = vmatpush.msrb.mxu2 %v665_v10 }
 0x16a   :  { %688 = vmatpush.msrb.mxu2 %v664_v20 }
 0x16c   :  { %689 = vmatpush.msrb.mxu2 %v663_v21 }
 0x1b5   :  { %v519_v34 = vpop.permute.xlu2 %518 }
 0x1b6   :  { %v525_v39 = vsel %vm359_vm6, %v466_v31, %v519_v34  ;;  %v696_v34 = vld [vmem:[#allocation12 + $0xf0] sm:$0xff] }
 0x1b7   :  { %716 = vmatpush.msrb.mxu3 %v696_v34 }
 0x1b9   :  { %717 = vmatpush.msrb.mxu3 %v695_v35 }
 0x1bd   :  { %v437_v29 = vpop.permute.xlu2 %436 }
 0x1c4   :  { %v433_v37 = vpop.permute.xlu1 %432 }
 0x1c5   :  { %v439_v40 = vsel %vm359_vm6, %v369_v38, %v433_v37  ;;  %v694_v38 = vld [vmem:[#allocation12 + $0xe0] sm:$0xff] }
 0x1c6   :  { %v440_v9 = vsel %vm304_vm1, %v439_v40, %v437_v29  ;;  %718 = vmatpush.msrb.mxu3 %v694_v38  ;;  %v934_v29 = vld [vmem:[#allocation12 + $0x80] ss:$0 sm:$0xff] }
 0x1cc   :  { %v562_v18 = vpop.permute.xlu1 %561 }
 0x1cd   :  { %v564_v19 = vsel %vm304_vm1, %v231_v17, %v562_v18 }
 0x1ce   :  { %909 = vmatmul.msk.f32.vlgmr.msra.gmra.mxu2 %vm571_vm4, %v564_v19 }
 0x1cf   :  { %v523_v41 = vpop.permute.xlu0 %522 }
 0x1d0   :  { %v526_v42 = vsel %vm304_vm1, %v525_v39, %v523_v41  ;;  %v933_v39 = vld [vmem:[#allocation12 + $0xd8] ss:$0 sm:$0xff] }
 0x1d1   :  { %v528_v43 = vrot.slane %v526_v42, 7 }
 0x1d3   :  { %v530_v44 = vsel %vm230_vm2, %v440_v9, %v528_v43  ;;  %v935_v43 = vld [vmem:[#allocation12 + $0x100] ss:$0 sm:$0xff] }
 0x1d4   :  { %908 = vmatmul.msk.f32.vlgmr.msra.gmra.mxu1 %vm536_vm3, %v530_v44 }
 0x1d7   :  { %v626_v1 = vpop.permute.xlu0 %625 }
 0x1d8   :  { %v628_v2 = vsel %vm304_vm1, %v297_v0, %v626_v1  ;;  %vm724_vm1 = vcmask 123904  }
 0x1dc   :  { %911 = vmatmul.msk.f32.vlgmr.msrb.gmra.mxu1 %vm571_vm4, %v628_v2 }
 0x251   :  { %v557_v12 = vpop.f32.mrf.mxu1  ;;  %v592_v37 = vpop.f32.mrf.mxu2 }
 0x252   :  { %v558_v13 = vadd.f32 %v930_v11, %v557_v12  ;;  %v593_v31 = vadd.f32 %v932_v36, %v592_v37 }
 0x254   :  { %659 = vrot.lane.b32.xlu2 %v558_v13, %s1045_s3  ;;  %910 = vmatmul.msk.f32.vlgmr.msra.gmra.mxu3 %vm571_vm4, %v593_v31 }
 0x259   :  { %v655_v25 = vpop.f32.mrf.mxu1 }
 0x25a   :  { %v656_v26 = vadd.f32 %v931_v24, %v655_v25 }
 0x2ae   :  { %v660_v27 = vpop.permute.xlu2 %659 }
 0x2af   :  { %v662_v28 = vsel %vm571_vm4, %v656_v26, %v660_v27 }
 0x2b0   :  { %912 = vmatmul.msk.f32.vlgmr.msrb.gmra.mxu2 %vm670_vm5, %v662_v28 }
 0x2d7   :  { %v621_v42 = vpop.f32.mrf.mxu3 }
 0x2d8   :  { %v622_v44 = vadd.f32 %v934_v29, %v621_v42 }
 0x333   :  { %v691_v40 = vpop.f32.mrf.mxu2 }
 0x334   :  { %v692_v41 = vadd.f32 %v933_v39, %v691_v40 }
 0x336   :  { %913 = vmatmul.msk.f32.vlgmr.msrb.gmra.mxu3 %vm571_vm4, %v692_v41 }
 0x3b9   :  { %v720_v9 = vpop.f32.mrf.mxu3 }
 0x3ba   :  { %v721_v45 = vadd.f32 %v935_v43, %v720_v9 }
 0x3bc   :  { %v723_v46 = vmul.f32 %v721_v45, %v622_v44 }
 0x3be   :  { %v725_v47 = vsel %vm724_vm1, %v723_v46, 0.0 }
 0x3bf   :  { %726 = vadd.xlane.f32.xlu0 %v725_v47 }
 0x432   :  { %v727_v48 = vpop.xlane.xlu0 %726 }
 0x433   :  { %v914_v49 = vmul.f32 -1.442695, %v727_v48 }
 0x435   :  { %936 = vpow2.f32 %v914_v49 }
 0x43b   :  { %v937_v50 = vpop.eup %936 }
 0x43c   :  { %v731_v51 = vadd.f32 1.0, %v937_v50 }
 0x43e   :  { %938 = vrcp.f32 %v731_v51  ;;  %v743_v56 = vand.u32 2147483648, %v731_v51  ;;  %v741_v58 = vand.u32 2147483647, %v731_v51  ;;  %vm737_vm7 = vweird.f32 %v731_v51 }
 0x440   :  { %v744_v60 = vor.u32 1.1754944e-38, %v743_v56  ;;  %vm742_vm9 = vcmp.eq.f32.partialorder %v741_v58, 8.507059e+37 }
 0x444   :  { %v939_v52 = vpop.eup %938 }
 0x445   :  { %v733_v53 = vmul.f32 %v939_v52, %v731_v51  ;;  %vm738_vm6 = vweird.f32 %v939_v52 }
 0x446   :  { %vm739_vm8 = vmor %vm737_vm7, %vm738_vm6 }
 0x447   :  { %v734_v54 = vsub.f32 1.0, %v733_v53 }
 0x449   :  { %v735_v57 = vmul.f32 %v939_v52, %v734_v54 }
 0x44b   :  { %v736_v59 = vadd.f32 %v939_v52, %v735_v57 }
 0x44d   :  { %v740_v61 = vsel %vm739_vm8, %v939_v52, %v736_v59 }
 0x44e   :  { %v745_v62 = vsel %vm742_vm9, %v744_v60, %v740_v61 }
 0x44f   :  { %v747_v63 = vmul.f32 5.0, %v745_v62 }
 0x451   :  { %749 = vst.msk [vmem:[%s1200_s6] sm:$0x3] %vm748_vm10, %v747_v63 }
 0x452   :  { %754 = vsyncpa [#allocation4], 1 }
 0x453   :  { %755 = vsyncpa [#allocation5], 1 }
 0x454   :  { %756 = vsyncpa [#allocation7], 1 }
 0x455   :  { %757 = vsyncpa [#allocation10], 1 }

</bundles_post_ra>
